<compile_context>
chip_gen: v6e
topology: v6e:2x2x1
jax: 0.10.0
libtpu: 0.0.40
codegen_flags: <defaults>
</compile_context>

<pallas_src>
import functools

import jax
import jax.numpy as jnp
from jax.experimental import pallas as pl
from jax.experimental.pallas import tpu as pltpu

EPS = 1e-5                             # nn.BatchNorm2d default eps
COUT_PAD = 128                         # lane-dense / MXU-aligned output-channel dim
RESIDENT_Y_BYTES = 24 * 1024 * 1024    # keep the conv output resident in VMEM up to this size


def _basic_block_kernel(p_ref, w_ref, gamma_ref, beta_ref, o_ref,
                        sum_ref, ssq_ref, scale_ref, shift_ref, *maybe_y,
                        inv_cnt, resident):
    # p_ref:     (4, TM, KKC_PAD) bf16 -- im2col rows of the 4 pooling-window corners of this tile
    # w_ref:     (KKC_PAD, COUT_PAD) bf16 (resident across the whole grid)
    # gamma_ref, beta_ref: (1, COUT_PAD) f32
    # o_ref:     (TM, COUT_PAD) bf16 -- pooled+ReLU rows of this tile
    # sum_ref, ssq_ref:     (8, COUT_PAD) f32 per-sublane partial stats (VALU-only accumulation)
    # scale_ref, shift_ref: (1, COUT_PAD) f32 folded BN affine, computed once at phase-1 start
    # maybe_y:   optional (T*4, TM, COUT_PAD) f32 resident conv output (single-pass mode)
    y_ref = maybe_y[0] if resident else None
    phase = pl.program_id(0)
    tile = pl.program_id(1)
    tm = o_ref.shape[0]

    @pl.when(jnp.logical_and(phase == 0, tile == 0))
    def _init():
        sum_ref[...] = jnp.zeros_like(sum_ref)
        ssq_ref[...] = jnp.zeros_like(ssq_ref)

    def conv_corners():
        # 4 MXU dots (one per pooling corner) against the resident RHS; f32 accumulation.
        return [jnp.dot(p_ref[c], w_ref[...], preferred_element_type=jnp.float32)
                for c in range(4)]

    @pl.when(phase == 0)
    def _phase0():
        ys = conv_corners()
        # Per-sublane partial sums: reshape to vreg-aligned (tm//8, 8, 128) and reduce the
        # leading axis (pure per-vreg VALU adds).  The 8->1 XLU collapse is deferred to phase 1.
        y3s = [y.reshape(tm // 8, 8, COUT_PAD) for y in ys]
        ps = jnp.sum(y3s[0], axis=0)
        pq = jnp.sum(y3s[0] * y3s[0], axis=0)
        for c in range(1, 4):
            ps = ps + jnp.sum(y3s[c], axis=0)
            pq = pq + jnp.sum(y3s[c] * y3s[c], axis=0)
        sum_ref[...] += ps
        ssq_ref[...] += pq
        if resident:
            for c in range(4):
                y_ref[tile * 4 + c] = ys[c]       # keep conv output resident -> true single pass

    # BN batch stats -> folded scale/shift, computed exactly once (first phase-1 step).
    @pl.when(jnp.logical_and(phase == 1, tile == 0))
    def _stats():
        s = jnp.sum(sum_ref[...], axis=0, keepdims=True)
        q = jnp.sum(ssq_ref[...], axis=0, keepdims=True)
        mean = s * inv_cnt
        # One-pass biased variance E[y^2]-mean^2 in f32; the clamp guards cancellation.
        # TODO(synk): switch to a shifted / two-pass formulation for very large N*OH*OW.
        var = jnp.maximum(q * inv_cnt - mean * mean, 0.0)
        scale = gamma_ref[...] * jax.lax.rsqrt(var + EPS)
        scale_ref[...] = scale
        shift_ref[...] = beta_ref[...] - mean * scale

    @pl.when(phase == 1)
    def _finalize():
        if resident:
            ys = [y_ref[tile * 4 + c] for c in range(4)]
        else:
            ys = conv_corners()                   # fallback: y did not fit in VMEM -> recompute
        scale = scale_ref[...]
        shift = shift_ref[...]
        # MaxPool2d(2,2): fold BN scale/shift into the 4-corner max, then ReLU; single store.
        pooled = ys[0] * scale + shift
        pooled = jnp.maximum(pooled, ys[1] * scale + shift)
        pooled = jnp.maximum(pooled, ys[2] * scale + shift)
        pooled = jnp.maximum(pooled, ys[3] * scale + shift)
        o_ref[...] = jnp.maximum(pooled, 0.0).astype(o_ref.dtype)


def basic_block_forward(x_nchw, conv_w, gamma, beta, *, kernel_size=5, stride=1, padding=0):
    N, Cin, H, W = x_nchw.shape
    Cout = conv_w.shape[0]
    K = kernel_size
    assert Cout <= COUT_PAD

    # ---- glue (plain JAX): NCHW -> NHWC, pad, im2col, pooling-corner split ----
    # TODO(synk): move im2col inside the kernel (DMA raw NHWC rows + K*K shifted-slice matmuls)
    # to kill the ~K*K x HBM inflation of the patch slab; kept host-side here since Cin is tiny.
    x = jnp.transpose(x_nchw, (0, 2, 3, 1)).astype(jnp.float32)          # NHWC
    if padding:
        x = jnp.pad(x, ((0, 0), (padding, padding), (padding, padding), (0, 0)))
    Hp, Wp = x.shape[1], x.shape[2]
    OH = (Hp - K) // stride + 1
    OW = (Wp - K) // stride + 1
    # TODO(synk): odd conv-output H/W (MaxPool2d drops trailing row/col) not supported by the
    # 4-corner decomposition; example shapes give an even 12x12 conv output.
    assert OH % 2 == 0 and OW % 2 == 0

    KKC = K * K * Cin
    KKC_PAD = ((KKC + 127) // 128) * 128

    cols = []
    for ky in range(K):
        for kx in range(K):
            cols.append(x[:, ky:ky + (OH - 1) * stride + 1:stride,
                            kx:kx + (OW - 1) * stride + 1:stride, :])
    # patches[n, oh, ow, (ky*K+kx)*Cin + c] = x[n, oh*s+ky, ow*s+kx, c]
    patches = jnp.stack(cols, axis=3).reshape(N, OH, OW, KKC)

    PH, PW = OH // 2, OW // 2
    M = N * PH * PW                     # pooled rows, ordered (n, ph, pw)
    corners = [patches[:, dy::2, dx::2, :].reshape(M, KKC)
               for dy in range(2) for dx in range(2)]
    # (4, M, KKC) -- no corner-major repack: the kernel reads a (4, TM, KKC_PAD) block directly,
    # which removes a full extra HBM copy of the inflated patch tensor in XLA glue.
    p = jnp.stack(corners, axis=0)

    # Row-tile size: up to 512 pooled rows, 16-row aligned (bf16 sublane packing).
    TM = min(512, ((M + 15) // 16) * 16)
    T = (M + TM - 1) // TM
    M_pad = T * TM

    # Zero padding is exact: padded rows/cols contribute 0 to the dot and to sum / sum-of-squares.
    p = jnp.pad(p, ((0, 0), (0, M_pad - M), (0, KKC_PAD - KKC))).astype(jnp.bfloat16)

    # PyTorch conv weight (Cout, Cin, K, K) -> (KKC, Cout) in (ky, kx, cin) row order, padded.
    w_mat = jnp.transpose(conv_w, (2, 3, 1, 0)).reshape(KKC, Cout).astype(jnp.float32)
    w_mat = jnp.pad(w_mat, ((0, KKC_PAD - KKC), (0, COUT_PAD - Cout))).astype(jnp.bfloat16)
    gamma_p = jnp.pad(gamma.reshape(1, Cout).astype(jnp.float32),
                      ((0, 0), (0, COUT_PAD - Cout)))
    beta_p = jnp.pad(beta.reshape(1, Cout).astype(jnp.float32),
                     ((0, 0), (0, COUT_PAD - Cout)))

    # Single-pass mode: keep all tiles' conv output resident in VMEM during phase 0 so phase 1
    # neither re-reads the patch slab from HBM nor re-runs the matmul.  Gate on VMEM budget
    # (v7x has only 64 MiB); otherwise fall back to recompute.
    y_bytes = T * 4 * TM * COUT_PAD * 4
    resident = y_bytes <= RESIDENT_Y_BYTES

    if resident:
        # In phase 1 the (unused) patch block stays parked at tile 0 -> at most one extra DMA.
        patch_map = lambda ph, i: (0, i * (1 - ph), 0)
    else:
        patch_map = lambda ph, i: (0, i, 0)

    scratch = [pltpu.VMEM((8, COUT_PAD), jnp.float32),   # per-sublane partial sum
               pltpu.VMEM((8, COUT_PAD), jnp.float32),   # per-sublane partial sum of squares
               pltpu.VMEM((1, COUT_PAD), jnp.float32),   # folded BN scale
               pltpu.VMEM((1, COUT_PAD), jnp.float32)]   # folded BN shift
    if resident:
        scratch.append(pltpu.VMEM((T * 4, TM, COUT_PAD), jnp.float32))  # resident conv output

    inv_cnt = 1.0 / float(N * OH * OW)   # biased batch stats over (N, OH, OW)
    kernel = functools.partial(_basic_block_kernel, inv_cnt=inv_cnt, resident=resident)

    out2d = pl.pallas_call(
        kernel,
        # bf16 output halves the (mostly channel-padding) output HBM bytes.
        # TODO(synk): pack 128/Cout pooled rows per 128-lane output row to drop the lane padding
        # entirely (needs an in-kernel lane interleave + host unpack).
        out_shape=jax.ShapeDtypeStruct((M_pad, COUT_PAD), jnp.bfloat16),
        grid_spec=pltpu.PrefetchScalarGridSpec(
            num_scalar_prefetch=0,
            grid=(2, T),                                   # (phase, row tile)
            in_specs=[
                pl.BlockSpec((4, TM, KKC_PAD), patch_map),
                pl.BlockSpec((KKC_PAD, COUT_PAD), lambda ph, i: (0, 0)),
                pl.BlockSpec((1, COUT_PAD), lambda ph, i: (0, 0)),
                pl.BlockSpec((1, COUT_PAD), lambda ph, i: (0, 0)),
            ],
            # INVARIANT: during phase 0 this block index never changes (stays (0, 0)), so the
            # never-written output buffer is not flushed to HBM; phase 1 then visits each tile
            # exactly once and writes it.  Do not change this index_map without preserving that.
            out_specs=pl.BlockSpec((TM, COUT_PAD), lambda ph, i: (ph * i, 0)),
            scratch_shapes=scratch,
        ),
        compiler_params=pltpu.CompilerParams(
            # Global BN reduction couples phase 0 and phase 1 -> both axes sequential.
            # TODO(synk): on v7x, split the tile axis across the 2 TensorCores with per-core
            # partial stats combined via CMEM + core_barrier.
            dimension_semantics=("arbitrary", "arbitrary"),
            vmem_limit_bytes=48 * 1024 * 1024),
    )(p, w_mat, gamma_p, beta_p)

    # rows are (n, ph, pw) ordered -> back to NCHW, dropping row/channel padding
    out = out2d[:M, :Cout].astype(jnp.float32)
    return out.reshape(N, PH, PW, Cout).transpose(0, 3, 1, 2)


def _reference(x_nchw, conv_w, gamma, beta, stride, padding):
    y = jax.lax.conv_general_dilated(
        x_nchw, conv_w, window_strides=(stride, stride),
        padding=[(padding, padding), (padding, padding)],
        dimension_numbers=("NCHW", "OIHW", "NCHW"),
        precision=jax.lax.Precision.HIGHEST)
    mean = y.mean(axis=(0, 2, 3), keepdims=True)
    var = ((y - mean) ** 2).mean(axis=(0, 2, 3), keepdims=True)
    yn = (y - mean) * jax.lax.rsqrt(var + EPS)
    yn = yn * gamma.reshape(1, -1, 1, 1) + beta.reshape(1, -1, 1, 1)
    n, c, oh, ow = yn.shape
    pooled = yn.reshape(n, c, oh // 2, 2, ow // 2, 2).max(axis=(3, 5))
    return jnp.maximum(pooled, 0.0)


if __name__ == "__main__":
    key = jax.random.PRNGKey(0)
    k_x, k_w = jax.random.split(key)

    N, Cin, Cout, H, W, K = 2, 4, 8, 16, 16, 5

    x = jax.random.normal(k_x, (N, Cin, H, W), dtype=jnp.float32)
    conv_w = 0.1 * jax.random.normal(k_w, (Cout, Cin, K, K), dtype=jnp.float32)
    gamma = jnp.ones((Cout,), jnp.float32)   # nn.BatchNorm2d default weight
    beta = jnp.zeros((Cout,), jnp.float32)   # nn.BatchNorm2d default bias

    out = basic_block_forward(x, conv_w, gamma, beta, kernel_size=K, stride=1, padding=0)
    out = jax.block_until_ready(out)

    ref = _reference(x, conv_w, gamma, beta, 1, 0)
    assert out.shape == (N, Cout, (H - K + 1) // 2, (W - K + 1) // 2), out.shape
    # Tolerance reflects bf16 MXU inputs / bf16 output vs a HIGHEST-precision f32 reference.
    assert jnp.allclose(out, ref, atol=3e-2, rtol=3e-2), float(jnp.max(jnp.abs(out - ref)))
    print("KERNEL_OK")
</pallas_src>

<mosaic_0001>
module attributes {stable_mosaic.version = 11 : i64} {
  func.func @_basic_block_kernel(%arg0: i32, %arg1: i32, %arg2: memref<4x80x128xbf16, #tpu.memory_space<vmem>>, %arg3: memref<128x128xbf16, #tpu.memory_space<vmem>>, %arg4: memref<1x128xf32, #tpu.memory_space<vmem>>, %arg5: memref<1x128xf32, #tpu.memory_space<vmem>>, %arg6: memref<80x128xbf16, #tpu.memory_space<vmem>>, %arg7: memref<8x128xf32, #tpu.memory_space<vmem>>, %arg8: memref<8x128xf32, #tpu.memory_space<vmem>>, %arg9: memref<1x128xf32, #tpu.memory_space<vmem>>, %arg10: memref<1x128xf32, #tpu.memory_space<vmem>>, %arg11: memref<4x80x128xf32, #tpu.memory_space<vmem>>) attributes {dimension_semantics = [#tpu.dimension_semantics<arbitrary>, #tpu.dimension_semantics<arbitrary>], iteration_bounds = array<i64: 2, 1>, scalar_prefetch = 0 : i64, scratch_operands = 5 : i64, tpu.core_type = #tpu.core_type<tc>, window_params = [{transform_indices = @transform_0, window_bounds = array<i64: 4, 80, 128>}, {pipeline_mode = #tpu.pipeline_mode<synchronous>, transform_indices = @transform_1, window_bounds = array<i64: 128, 128>}, {pipeline_mode = #tpu.pipeline_mode<synchronous>, transform_indices = @transform_2, window_bounds = array<i64: 1, 128>}, {pipeline_mode = #tpu.pipeline_mode<synchronous>, transform_indices = @transform_3, window_bounds = array<i64: 1, 128>}, {transform_indices = @transform_4, window_bounds = array<i64: 80, 128>}]} {
    %c0_i32 = arith.constant 0 : i32
    %0 = arith.cmpi eq, %arg0, %c0_i32 : i32
    %c0_i32_0 = arith.constant 0 : i32
    %1 = arith.cmpi eq, %arg1, %c0_i32_0 : i32
    %2 = arith.andi %0, %1 : i1
    %3 = arith.extui %2 : i1 to i32
    %c0_i32_1 = arith.constant 0 : i32
    %4 = arith.cmpi ne, %3, %c0_i32_1 : i32
    scf.if %4 {
      %cst = arith.constant 0.000000e+00 : f32
      %16 = vector.broadcast %cst : f32 to vector<8x128xf32>
      %c0 = arith.constant 0 : index
      %c0_8 = arith.constant 0 : index
      %17 = vector.load %arg7[%c0, %c0_8] : memref<8x128xf32, #tpu.memory_space<vmem>>, vector<8x128xf32>
      tpu.vector_store %arg7[%c0, %c0_8], %16 {strides = array<i32>} : memref<8x128xf32, #tpu.memory_space<vmem>>, vector<8x128xf32>,
      %cst_9 = arith.constant 0.000000e+00 : f32
      %18 = vector.broadcast %cst_9 : f32 to vector<8x128xf32>
      %c0_10 = arith.constant 0 : index
      %c0_11 = arith.constant 0 : index
      %19 = vector.load %arg8[%c0_10, %c0_11] : memref<8x128xf32, #tpu.memory_space<vmem>>, vector<8x128xf32>
      tpu.vector_store %arg8[%c0_10, %c0_11], %18 {strides = array<i32>} : memref<8x128xf32, #tpu.memory_space<vmem>>, vector<8x128xf32>,
    } else {
    }
    %c0_i32_2 = arith.constant 0 : i32
    %5 = arith.cmpi eq, %arg0, %c0_i32_2 : i32
    %6 = arith.extui %5 : i1 to i32
    %c0_i32_3 = arith.constant 0 : i32
    %7 = arith.cmpi ne, %6, %c0_i32_3 : i32
    scf.if %7 {
      %c0 = arith.constant 0 : index
      %c0_8 = arith.constant 0 : index
      %c0_9 = arith.constant 0 : index
      %16 = vector.load %arg2[%c0, %c0_8, %c0_9] : memref<4x80x128xbf16, #tpu.memory_space<vmem>>, vector<1x80x128xbf16>
      %17 = vector.shape_cast %16 : vector<1x80x128xbf16> to vector<80x128xbf16>
      %c0_10 = arith.constant 0 : index
      %c0_11 = arith.constant 0 : index
      %18 = vector.load %arg3[%c0_10, %c0_11] : memref<128x128xbf16, #tpu.memory_space<vmem>>, vector<128x128xbf16>
      %cst = arith.constant dense<0.000000e+00> : vector<80x128xf32>
      %19 = tpu.matmul %17, %18, %cst {dimension_numbers = #tpu.dot_dimension_numbers<[1], [0], [0], [1], [0, 0, 1, 1], [], []>} : vector<80x128xbf16>, vector<128x128xbf16>, vector<80x128xf32> -> vector<80x128xf32>
      %c1 = arith.constant 1 : index
      %c0_12 = arith.constant 0 : index
      %c0_13 = arith.constant 0 : index
      %20 = vector.load %arg2[%c1, %c0_12, %c0_13] : memref<4x80x128xbf16, #tpu.memory_space<vmem>>, vector<1x80x128xbf16>
      %21 = vector.shape_cast %20 : vector<1x80x128xbf16> to vector<80x128xbf16>
      %c0_14 = arith.constant 0 : index
      %c0_15 = arith.constant 0 : index
      %22 = vector.load %arg3[%c0_14, %c0_15] : memref<128x128xbf16, #tpu.memory_space<vmem>>, vector<128x128xbf16>
      %cst_16 = arith.constant dense<0.000000e+00> : vector<80x128xf32>
      %23 = tpu.matmul %21, %22, %cst_16 {dimension_numbers = #tpu.dot_dimension_numbers<[1], [0], [0], [1], [0, 0, 1, 1], [], []>} : vector<80x128xbf16>, vector<128x128xbf16>, vector<80x128xf32> -> vector<80x128xf32>
      %c2 = arith.constant 2 : index
      %c0_17 = arith.constant 0 : index
      %c0_18 = arith.constant 0 : index
      %24 = vector.load %arg2[%c2, %c0_17, %c0_18] : memref<4x80x128xbf16, #tpu.memory_space<vmem>>, vector<1x80x128xbf16>
      %25 = vector.shape_cast %24 : vector<1x80x128xbf16> to vector<80x128xbf16>
      %c0_19 = arith.constant 0 : index
      %c0_20 = arith.constant 0 : index
      %26 = vector.load %arg3[%c0_19, %c0_20] : memref<128x128xbf16, #tpu.memory_space<vmem>>, vector<128x128xbf16>
      %cst_21 = arith.constant dense<0.000000e+00> : vector<80x128xf32>
      %27 = tpu.matmul %25, %26, %cst_21 {dimension_numbers = #tpu.dot_dimension_numbers<[1], [0], [0], [1], [0, 0, 1, 1], [], []>} : vector<80x128xbf16>, vector<128x128xbf16>, vector<80x128xf32> -> vector<80x128xf32>
      %c3 = arith.constant 3 : index
      %c0_22 = arith.constant 0 : index
      %c0_23 = arith.constant 0 : index
      %28 = vector.load %arg2[%c3, %c0_22, %c0_23] : memref<4x80x128xbf16, #tpu.memory_space<vmem>>, vector<1x80x128xbf16>
      %29 = vector.shape_cast %28 : vector<1x80x128xbf16> to vector<80x128xbf16>
      %c0_24 = arith.constant 0 : index
      %c0_25 = arith.constant 0 : index
      %30 = vector.load %arg3[%c0_24, %c0_25] : memref<128x128xbf16, #tpu.memory_space<vmem>>, vector<128x128xbf16>
      %cst_26 = arith.constant dense<0.000000e+00> : vector<80x128xf32>
      %31 = tpu.matmul %29, %30, %cst_26 {dimension_numbers = #tpu.dot_dimension_numbers<[1], [0], [0], [1], [0, 0, 1, 1], [], []>} : vector<80x128xbf16>, vector<128x128xbf16>, vector<80x128xf32> -> vector<80x128xf32>
      %32 = vector.shape_cast %19 : vector<80x128xf32> to vector<10x8x128xf32>
      %33 = vector.shape_cast %23 : vector<80x128xf32> to vector<10x8x128xf32>
      %34 = vector.shape_cast %27 : vector<80x128xf32> to vector<10x8x128xf32>
      %35 = vector.shape_cast %31 : vector<80x128xf32> to vector<10x8x128xf32>
      %cst_27 = arith.constant dense<0.000000e+00> : vector<8x128xf32>
      %36 = vector.multi_reduction <add>, %32, %cst_27 [0] : vector<10x8x128xf32> to vector<8x128xf32>
      %37 = arith.mulf %32, %32 : vector<10x8x128xf32>
      %cst_28 = arith.constant dense<0.000000e+00> : vector<8x128xf32>
      %38 = vector.multi_reduction <add>, %37, %cst_28 [0] : vector<10x8x128xf32> to vector<8x128xf32>
      %cst_29 = arith.constant dense<0.000000e+00> : vector<8x128xf32>
      %39 = vector.multi_reduction <add>, %33, %cst_29 [0] : vector<10x8x128xf32> to vector<8x128xf32>
      %40 = arith.addf %36, %39 : vector<8x128xf32>
      %41 = arith.mulf %33, %33 : vector<10x8x128xf32>
      %cst_30 = arith.constant dense<0.000000e+00> : vector<8x128xf32>
      %42 = vector.multi_reduction <add>, %41, %cst_30 [0] : vector<10x8x128xf32> to vector<8x128xf32>
      %43 = arith.addf %38, %42 : vector<8x128xf32>
      %cst_31 = arith.constant dense<0.000000e+00> : vector<8x128xf32>
      %44 = vector.multi_reduction <add>, %34, %cst_31 [0] : vector<10x8x128xf32> to vector<8x128xf32>
      %45 = arith.addf %40, %44 : vector<8x128xf32>
      %46 = arith.mulf %34, %34 : vector<10x8x128xf32>
      %cst_32 = arith.constant dense<0.000000e+00> : vector<8x128xf32>
      %47 = vector.multi_reduction <add>, %46, %cst_32 [0] : vector<10x8x128xf32> to vector<8x128xf32>
      %48 = arith.addf %43, %47 : vector<8x128xf32>
      %cst_33 = arith.constant dense<0.000000e+00> : vector<8x128xf32>
      %49 = vector.multi_reduction <add>, %35, %cst_33 [0] : vector<10x8x128xf32> to vector<8x128xf32>
      %50 = arith.addf %45, %49 : vector<8x128xf32>
      %51 = arith.mulf %35, %35 : vector<10x8x128xf32>
      %cst_34 = arith.constant dense<0.000000e+00> : vector<8x128xf32>
      %52 = vector.multi_reduction <add>, %51, %cst_34 [0] : vector<10x8x128xf32> to vector<8x128xf32>
      %53 = arith.addf %48, %52 : vector<8x128xf32>
      %c0_35 = arith.constant 0 : index
      %c0_36 = arith.constant 0 : index
      %54 = vector.load %arg7[%c0_35, %c0_36] : memref<8x128xf32, #tpu.memory_space<vmem>>, vector<8x128xf32>
      %55 = arith.addf %54, %50 : vector<8x128xf32>
      %c0_37 = arith.constant 0 : index
      %c0_38 = arith.constant 0 : index
      %56 = vector.load %arg7[%c0_37, %c0_38] : memref<8x128xf32, #tpu.memory_space<vmem>>, vector<8x128xf32>
      tpu.vector_store %arg7[%c0_37, %c0_38], %55 {strides = array<i32>} : memref<8x128xf32, #tpu.memory_space<vmem>>, vector<8x128xf32>,
      %c0_39 = arith.constant 0 : index
      %c0_40 = arith.constant 0 : index
      %57 = vector.load %arg8[%c0_39, %c0_40] : memref<8x128xf32, #tpu.memory_space<vmem>>, vector<8x128xf32>
      %58 = arith.addf %57, %53 : vector<8x128xf32>
      %c0_41 = arith.constant 0 : index
      %c0_42 = arith.constant 0 : index
      %59 = vector.load %arg8[%c0_41, %c0_42] : memref<8x128xf32, #tpu.memory_space<vmem>>, vector<8x128xf32>
      tpu.vector_store %arg8[%c0_41, %c0_42], %58 {strides = array<i32>} : memref<8x128xf32, #tpu.memory_space<vmem>>, vector<8x128xf32>,
      %c4_i32 = arith.constant 4 : i32
      %60 = arith.muli %arg1, %c4_i32 : i32
      %c0_i32_43 = arith.constant 0 : i32
      %61 = arith.addi %60, %c0_i32_43 : i32
      %62 = arith.index_cast %61 : i32 to index
      %c0_44 = arith.constant 0 : index
      %c0_45 = arith.constant 0 : index
      %63 = vector.load %arg11[%62, %c0_44, %c0_45] : memref<4x80x128xf32, #tpu.memory_space<vmem>>, vector<1x80x128xf32>
      %64 = vector.shape_cast %63 : vector<1x80x128xf32> to vector<80x128xf32>
      %65 = vector.shape_cast %19 : vector<80x128xf32> to vector<1x80x128xf32>
      tpu.vector_store %arg11[%62, %c0_44, %c0_45], %65 {strides = array<i32>} : memref<4x80x128xf32, #tpu.memory_space<vmem>>, vector<1x80x128xf32>,
      %c4_i32_46 = arith.constant 4 : i32
      %66 = arith.muli %arg1, %c4_i32_46 : i32
      %c1_i32_47 = arith.constant 1 : i32
      %67 = arith.addi %66, %c1_i32_47 : i32
      %68 = arith.index_cast %67 : i32 to index
      %c0_48 = arith.constant 0 : index
      %c0_49 = arith.constant 0 : index
      %69 = vector.load %arg11[%68, %c0_48, %c0_49] : memref<4x80x128xf32, #tpu.memory_space<vmem>>, vector<1x80x128xf32>
      %70 = vector.shape_cast %69 : vector<1x80x128xf32> to vector<80x128xf32>
      %71 = vector.shape_cast %23 : vector<80x128xf32> to vector<1x80x128xf32>
      tpu.vector_store %arg11[%68, %c0_48, %c0_49], %71 {strides = array<i32>} : memref<4x80x128xf32, #tpu.memory_space<vmem>>, vector<1x80x128xf32>,
      %c4_i32_50 = arith.constant 4 : i32
      %72 = arith.muli %arg1, %c4_i32_50 : i32
      %c2_i32 = arith.constant 2 : i32
      %73 = arith.addi %72, %c2_i32 : i32
      %74 = arith.index_cast %73 : i32 to index
      %c0_51 = arith.constant 0 : index
      %c0_52 = arith.constant 0 : index
      %75 = vector.load %arg11[%74, %c0_51, %c0_52] : memref<4x80x128xf32, #tpu.memory_space<vmem>>, vector<1x80x128xf32>
      %76 = vector.shape_cast %75 : vector<1x80x128xf32> to vector<80x128xf32>
      %77 = vector.shape_cast %27 : vector<80x128xf32> to vector<1x80x128xf32>
      tpu.vector_store %arg11[%74, %c0_51, %c0_52], %77 {strides = array<i32>} : memref<4x80x128xf32, #tpu.memory_space<vmem>>, vector<1x80x128xf32>,
      %c4_i32_53 = arith.constant 4 : i32
      %78 = arith.muli %arg1, %c4_i32_53 : i32
      %c3_i32 = arith.constant 3 : i32
      %79 = arith.addi %78, %c3_i32 : i32
      %80 = arith.index_cast %79 : i32 to index
      %c0_54 = arith.constant 0 : index
      %c0_55 = arith.constant 0 : index
      %81 = vector.load %arg11[%80, %c0_54, %c0_55] : memref<4x80x128xf32, #tpu.memory_space<vmem>>, vector<1x80x128xf32>
      %82 = vector.shape_cast %81 : vector<1x80x128xf32> to vector<80x128xf32>
      %83 = vector.shape_cast %31 : vector<80x128xf32> to vector<1x80x128xf32>
      tpu.vector_store %arg11[%80, %c0_54, %c0_55], %83 {strides = array<i32>} : memref<4x80x128xf32, #tpu.memory_space<vmem>>, vector<1x80x128xf32>,
    } else {
    }
    %c1_i32 = arith.constant 1 : i32
    %8 = arith.cmpi eq, %arg0, %c1_i32 : i32
    %c0_i32_4 = arith.constant 0 : i32
    %9 = arith.cmpi eq, %arg1, %c0_i32_4 : i32
    %10 = arith.andi %8, %9 : i1
    %11 = arith.extui %10 : i1 to i32
    %c0_i32_5 = arith.constant 0 : i32
    %12 = arith.cmpi ne, %11, %c0_i32_5 : i32
    scf.if %12 {
      %c0 = arith.constant 0 : index
      %c0_8 = arith.constant 0 : index
      %16 = vector.load %arg7[%c0, %c0_8] : memref<8x128xf32, #tpu.memory_space<vmem>>, vector<8x128xf32>
      %cst = arith.constant dense<0.000000e+00> : vector<128xf32>
      %17 = vector.multi_reduction <add>, %16, %cst [0] : vector<8x128xf32> to vector<128xf32>
      %18 = vector.shape_cast %17 : vector<128xf32> to vector<1x128xf32>
      %c0_9 = arith.constant 0 : index
      %c0_10 = arith.constant 0 : index
      %19 = vector.load %arg8[%c0_9, %c0_10] : memref<8x128xf32, #tpu.memory_space<vmem>>, vector<8x128xf32>
      %cst_11 = arith.constant dense<0.000000e+00> : vector<128xf32>
      %20 = vector.multi_reduction <add>, %19, %cst_11 [0] : vector<8x128xf32> to vector<128xf32>
      %21 = vector.shape_cast %20 : vector<128xf32> to vector<1x128xf32>
      %cst_12 = arith.constant 0.00347222225 : f32
      %22 = vector.broadcast %cst_12 : f32 to vector<1x128xf32>
      %23 = arith.mulf %18, %22 : vector<1x128xf32>
      %cst_13 = arith.constant 0.00347222225 : f32
      %24 = vector.broadcast %cst_13 : f32 to vector<1x128xf32>
      %25 = arith.mulf %21, %24 : vector<1x128xf32>
      %26 = arith.mulf %23, %23 : vector<1x128xf32>
      %27 = arith.subf %25, %26 : vector<1x128xf32>
      %cst_14 = arith.constant 0.000000e+00 : f32
      %28 = vector.broadcast %cst_14 : f32 to vector<1x128xf32>
      %29 = arith.maximumf %27, %28 : vector<1x128xf32>
      %c0_15 = arith.constant 0 : index
      %c0_16 = arith.constant 0 : index
      %30 = vector.load %arg4[%c0_15, %c0_16] : memref<1x128xf32, #tpu.memory_space<vmem>>, vector<1x128xf32>
      %cst_17 = arith.constant 9.99999974E-6 : f32
      %31 = vector.broadcast %cst_17 : f32 to vector<1x128xf32>
      %32 = arith.addf %29, %31 : vector<1x128xf32>
      %33 = math.rsqrt %32 : vector<1x128xf32>
      %34 = arith.mulf %30, %33 : vector<1x128xf32>
      %c0_18 = arith.constant 0 : index
      %c0_19 = arith.constant 0 : index
      %35 = vector.load %arg9[%c0_18, %c0_19] : memref<1x128xf32, #tpu.memory_space<vmem>>, vector<1x128xf32>
      tpu.vector_store %arg9[%c0_18, %c0_19], %34 {strides = array<i32>} : memref<1x128xf32, #tpu.memory_space<vmem>>, vector<1x128xf32>,
      %c0_20 = arith.constant 0 : index
      %c0_21 = arith.constant 0 : index
      %36 = vector.load %arg5[%c0_20, %c0_21] : memref<1x128xf32, #tpu.memory_space<vmem>>, vector<1x128xf32>
      %37 = arith.mulf %23, %34 : vector<1x128xf32>
      %38 = arith.subf %36, %37 : vector<1x128xf32>
      %c0_22 = arith.constant 0 : index
      %c0_23 = arith.constant 0 : index
      %39 = vector.load %arg10[%c0_22, %c0_23] : memref<1x128xf32, #tpu.memory_space<vmem>>, vector<1x128xf32>
      tpu.vector_store %arg10[%c0_22, %c0_23], %38 {strides = array<i32>} : memref<1x128xf32, #tpu.memory_space<vmem>>, vector<1x128xf32>,
    } else {
    }
    %c1_i32_6 = arith.constant 1 : i32
    %13 = arith.cmpi eq, %arg0, %c1_i32_6 : i32
    %14 = arith.extui %13 : i1 to i32
    %c0_i32_7 = arith.constant 0 : i32
    %15 = arith.cmpi ne, %14, %c0_i32_7 : i32
    scf.if %15 {
      %c4_i32 = arith.constant 4 : i32
      %16 = arith.muli %arg1, %c4_i32 : i32
      %c0_i32_8 = arith.constant 0 : i32
      %17 = arith.addi %16, %c0_i32_8 : i32
      %18 = arith.index_cast %17 : i32 to index
      %c0 = arith.constant 0 : index
      %c0_9 = arith.constant 0 : index
      %19 = vector.load %arg11[%18, %c0, %c0_9] : memref<4x80x128xf32, #tpu.memory_space<vmem>>, vector<1x80x128xf32>
      %20 = vector.shape_cast %19 : vector<1x80x128xf32> to vector<80x128xf32>
      %c4_i32_10 = arith.constant 4 : i32
      %21 = arith.muli %arg1, %c4_i32_10 : i32
      %c1_i32_11 = arith.constant 1 : i32
      %22 = arith.addi %21, %c1_i32_11 : i32
      %23 = arith.index_cast %22 : i32 to index
      %c0_12 = arith.constant 0 : index
      %c0_13 = arith.constant 0 : index
      %24 = vector.load %arg11[%23, %c0_12, %c0_13] : memref<4x80x128xf32, #tpu.memory_space<vmem>>, vector<1x80x128xf32>
      %25 = vector.shape_cast %24 : vector<1x80x128xf32> to vector<80x128xf32>
      %c4_i32_14 = arith.constant 4 : i32
      %26 = arith.muli %arg1, %c4_i32_14 : i32
      %c2_i32 = arith.constant 2 : i32
      %27 = arith.addi %26, %c2_i32 : i32
      %28 = arith.index_cast %27 : i32 to index
      %c0_15 = arith.constant 0 : index
      %c0_16 = arith.constant 0 : index
      %29 = vector.load %arg11[%28, %c0_15, %c0_16] : memref<4x80x128xf32, #tpu.memory_space<vmem>>, vector<1x80x128xf32>
      %30 = vector.shape_cast %29 : vector<1x80x128xf32> to vector<80x128xf32>
      %c4_i32_17 = arith.constant 4 : i32
      %31 = arith.muli %arg1, %c4_i32_17 : i32
      %c3_i32 = arith.constant 3 : i32
      %32 = arith.addi %31, %c3_i32 : i32
      %33 = arith.index_cast %32 : i32 to index
      %c0_18 = arith.constant 0 : index
      %c0_19 = arith.constant 0 : index
      %34 = vector.load %arg11[%33, %c0_18, %c0_19] : memref<4x80x128xf32, #tpu.memory_space<vmem>>, vector<1x80x128xf32>
      %35 = vector.shape_cast %34 : vector<1x80x128xf32> to vector<80x128xf32>
      %c0_20 = arith.constant 0 : index
      %c0_21 = arith.constant 0 : index
      %36 = vector.load %arg9[%c0_20, %c0_21] : memref<1x128xf32, #tpu.memory_space<vmem>>, vector<1x128xf32>
      %c0_22 = arith.constant 0 : index
      %c0_23 = arith.constant 0 : index
      %37 = vector.load %arg10[%c0_22, %c0_23] : memref<1x128xf32, #tpu.memory_space<vmem>>, vector<1x128xf32>
      %38 = vector.broadcast %36 : vector<1x128xf32> to vector<80x128xf32>
      %39 = arith.mulf %20, %38 : vector<80x128xf32>
      %40 = vector.broadcast %37 : vector<1x128xf32> to vector<80x128xf32>
      %41 = arith.addf %39, %40 : vector<80x128xf32>
      %42 = vector.broadcast %36 : vector<1x128xf32> to vector<80x128xf32>
      %43 = arith.mulf %25, %42 : vector<80x128xf32>
      %44 = vector.broadcast %37 : vector<1x128xf32> to vector<80x128xf32>
      %45 = arith.addf %43, %44 : vector<80x128xf32>
      %46 = arith.maximumf %41, %45 : vector<80x128xf32>
      %47 = vector.broadcast %36 : vector<1x128xf32> to vector<80x128xf32>
      %48 = arith.mulf %30, %47 : vector<80x128xf32>
      %49 = vector.broadcast %37 : vector<1x128xf32> to vector<80x128xf32>
      %50 = arith.addf %48, %49 : vector<80x128xf32>
      %51 = arith.maximumf %46, %50 : vector<80x128xf32>
      %52 = vector.broadcast %36 : vector<1x128xf32> to vector<80x128xf32>
      %53 = arith.mulf %35, %52 : vector<80x128xf32>
      %54 = vector.broadcast %37 : vector<1x128xf32> to vector<80x128xf32>
      %55 = arith.addf %53, %54 : vector<80x128xf32>
      %56 = arith.maximumf %51, %55 : vector<80x128xf32>
      %cst = arith.constant 0.000000e+00 : f32
      %57 = vector.broadcast %cst : f32 to vector<80x128xf32>
      %58 = arith.maximumf %56, %57 : vector<80x128xf32>
      %59 = arith.truncf %58 : vector<80x128xf32> to vector<80x128xbf16>
      %c0_24 = arith.constant 0 : index
      %c0_25 = arith.constant 0 : index
      %60 = vector.load %arg6[%c0_24, %c0_25] : memref<80x128xbf16, #tpu.memory_space<vmem>>, vector<80x128xbf16>
      tpu.vector_store %arg6[%c0_24, %c0_25], %59 {strides = array<i32>} : memref<80x128xbf16, #tpu.memory_space<vmem>>, vector<80x128xbf16>,
    } else {
    }
    return
  }
  func.func @transform_0(%arg0: i32, %arg1: i32) -> (i32, i32, i32) {
    %c1_i32 = arith.constant 1 : i32
    %0 = arith.subi %c1_i32, %arg0 : i32
    %1 = arith.muli %arg1, %0 : i32
    %c0_i32 = arith.constant 0 : i32
    %c0_i32_0 = arith.constant 0 : i32
    %c0_i32_1 = arith.constant 0 : i32
    return %c0_i32, %1, %c0_i32_0 : i32, i32, i32
  }
  func.func @transform_1(%arg0: i32, %arg1: i32) -> (i32, i32) {
    %c0_i32 = arith.constant 0 : i32
    %c0_i32_0 = arith.constant 0 : i32
    %c0_i32_1 = arith.constant 0 : i32
    return %c0_i32, %c0_i32_0 : i32, i32
  }
  func.func @transform_2(%arg0: i32, %arg1: i32) -> (i32, i32) {
    %c0_i32 = arith.constant 0 : i32
    %c0_i32_0 = arith.constant 0 : i32
    %c0_i32_1 = arith.constant 0 : i32
    return %c0_i32, %c0_i32_0 : i32, i32
  }
  func.func @transform_3(%arg0: i32, %arg1: i32) -> (i32, i32) {
    %c0_i32 = arith.constant 0 : i32
    %c0_i32_0 = arith.constant 0 : i32
    %c0_i32_1 = arith.constant 0 : i32
    return %c0_i32, %c0_i32_0 : i32, i32
  }
  func.func @transform_4(%arg0: i32, %arg1: i32) -> (i32, i32) {
    %0 = arith.muli %arg0, %arg1 : i32
    %c0_i32 = arith.constant 0 : i32
    %c0_i32_0 = arith.constant 0 : i32
    return %0, %c0_i32 : i32, i32
  }
}

</mosaic_0001>

<bundles_post_ra>
// kernel: tpu_custom_call.1
= control target key start
LH: loop header
LB: loop body
LE: loop exit
PB: predicated region body
PF: predicated region fallthrough
CT: control target
= control target key end

     0   :  { %9 = vsyncpa [#allocation8], 0  ;;  %s2417_s0 = inlined_call_operand.hbm [shape: bf16[4,80,128], index: 0, kind: input, shape index: {}]   ;;  %s2418_s1 = inlined_call_operand.hbm [shape: bf16[128,128], index: 1, kind: input, shape index: {}]   ;;  %s2419_s2 = inlined_call_operand.vmem [shape: f32[1,128], index: 2, kind: input, shape index: {}]   ;;  %s2420_s3 = inlined_call_operand.vmem [shape: f32[1,128], index: 3, kind: input, shape index: {}]   ;;  %s2421_s4 = inlined_call_operand.hbm [shape: bf16[80,128], index: 4, kind: output, shape index: {}]  }
   0x1   :  { %11 = vsyncpa [#allocation8 + $0x1], 0 }
   0x2   :  { %12 = vsyncpa [#allocation11], 0 }
   0x3   :  { %13 = vsyncpa [#allocation9], 0 }
   0x4   :  { %15 = vsyncpa [#allocation9 + $0x1], 0  ;;  %s1996_s15 = smov 0   ;;  %s1998_s16 = smov 0  }
   0x5   :  { %s2000_s17 = smov 0  }
   0x6 LB: > { %s1369_s18 = sadd.s32 4294967295, %s1959_s17   ;;  %s1370_s19 = sadd.s32 4294967294, %s1959_s17   ;;  %s1959_s17 = sphi %s2000_s17, %s21_s17   ;;  %s1955_s16 = sphi %s1998_s16, %s2429_s16   ;;  %s1951_s15 = sphi %s1996_s15, %s2428_s15  }
   0x7   : > { %s33_s20 = sadd.s32 1, %s1955_s16  ;;  %p1371_p0 = scmp.ge.s32.totalorder %s1959_s17, 1 }
   0x8   : > { %p35_p1 = scmp.ge.s32.totalorder %s33_s20, 2  ;;  %p159_p2 = scmp.lt.s32.totalorder %s1959_s17, 3 }
   0x9   : > { %p2018_p3 = scmp.eq.s32.totalorder %s1369_s18, 0  ;;  %s1961_s23 = smov [#allocation10]  }
   0xa   : > { %s2431_s20 = smov (%p35_p1, %s33_s20), 0  ;;  %p2024_p4 = pnand %p1371_p0, %p159_p2 }
   0xb   : > { %s171_s24 = sshll.u32 %s1961_s23, 4  ;;  %p1373_p6 = scmp.ge.s32.totalorder %s1959_s17, 2  ;;  %s172_s24 = int_to_ptr.vmem [resolvable:$true] %s171_s24 }
   0xc   : > { %s2424_s22 = scalar_select %p2024_p4, 1, 0 }
   0xd   : > { %p1765_p5 = pneg %p2024_p4  ;;  %p1778_p8 = scmp.lt.s32.totalorder %s1959_s17, 2 }
   0xe   : > { %p1779_p9 = scmp.eq.s32.totalorder %s1959_s17, 0  ;;  %s1860_s26 = scalar_lea.vmem %s172_s24, 1024 }
   0xf   : > { %p2033_p7 = pnand %p2018_p3, %p1765_p5  ;;  %p1861_p11 = scmp.ne.s32.totalorder %s172_s24, %s1860_s26 }
  0x10   : > { %p1868_p0 = scmp.lt.s32.totalorder %s172_s24, %s172_s24  ;;  %p1869_p1 = scmp.lt.s32.totalorder %s1860_s26, %s1860_s26 }
  0x11   : > { %p1851_p10 = pneg %p2033_p7 }
  0x12   : > { %p1870_p2 = por %p1869_p1, %p1868_p0 }
  0x13   : > { %p1863_p12 = pnand %p1861_p11, %p1851_p10 }
  0x15   : > { %p1864_p13 = pneg %p1863_p12 }
  0x17   : > { %p1871_p4 = pnand %p1870_p2, %p1864_p13 }
  0x19   : > { %1874 = shalt.err (!%p1871_p4)
}
  0x1a   : > { %s1962_s27 = smov 64   ;;  %s1963_s28 = smov 4  }
  0x1b   : > { %1768 = dma.hbm_to_vmem [thread:$0]  (!%p2033_p7), %s2418_s1, 1024, %s172_s24, [#allocation11], %s1962_s27, %s1962_s27, %s1963_s28  }
  0x1c   : > { %s1964_s5 = smov [#allocation7]   ;;  %p1770_p5 = pnand %p1779_p9, %p1778_p8 }
  0x1d   : > { %s204_s6 = sshll.u32 %s1964_s5, 4  ;;  %s205_s6 = int_to_ptr.vmem [resolvable:$true] %s204_s6 }
  0x1e   : > { %p1877_p10 = pneg %p1770_p5  ;;  %s1886_s7 = scalar_lea.vmem %s205_s6, 2560 }
  0x1f   : > { %p1887_p11 = scmp.ne.s32.totalorder %s205_s6, %s1886_s7  ;;  %s1893_s8 = scalar_lea.vmem %s205_s6, 5120 }
  0x20   : > { %p1894_p13 = scmp.lt.s32.totalorder %s205_s6, %s205_s6  ;;  %p1895_p0 = scmp.lt.s32.totalorder %s1893_s8, %s1886_s7 }
  0x21   : > { %p1889_p4 = pnand %p1887_p11, %p1877_p10 }
  0x22   : > { %p1896_p1 = por %p1895_p0, %p1894_p13 }
  0x23   : > { %p1890_p12 = pneg %p1889_p4 }
  0x25   : > { %p1897_p2 = pnand %p1896_p1, %p1890_p12 }
  0x27   : > { %1900 = shalt.err (!%p1897_p2)
}
  0x28   : > { %1772 = dma.hbm_to_vmem [thread:$0]  (!%p1770_p5), %s2417_s0, 2560, %s205_s6, [#allocation8], %s1962_s27, %s1962_s27, %s1963_s28  }
  0x29   : > { %p2426_p7 = scmp.ne.s32.totalorder %s2424_s22, 0 }
  0x2b   : > { %216 = sbr.rel (%p2426_p7) target bundleno = 488 (0x1e8), region = 36 }
  0x30   : > { %1938 = dma.done.wait (%p2018_p3), [#allocation8], 2560  }
  0x31   : > { %1940 = vsyncadd (%p2018_p3), [#allocation8], 4294964736 }
  0x32   : > { %1942 = dma.done.wait (%p2018_p3), [#allocation11], 1024  }
  0x33   : > { %1944 = vsyncadd (%p2018_p3), [#allocation11], 4294966272  ;;  %p257_p8 = scmp.eq.s32.totalorder %s1951_s15, 0 }
  0x34   : > { %v1965_v0 = vmov (%p257_p8), 0.0  }
  0x35   : > { %262 = sbr.rel (!%p257_p8) target bundleno = 58 (0x3a), region = 48  ;;  %263 = vst [vmem:[#allocation2] sm:$0xff] (%p257_p8), %v1965_v0  ;;  %264 = vst [vmem:[#allocation3] sm:$0xff] (%p257_p8), %v1965_v0 }
  0x3a PF: > { %p1379_p9 = scmp.ne.s32.totalorder %s1951_s15, 0 }
  0x3c   : > { %267 = sbr.rel (%p1379_p9) target bundleno = 378 (0x17a), region = 52 }
  0x41   : > { %v1819_v1 = vld [vmem:[#allocation10 + $0x38] sm:$0xff]   ;;  %v1966_v2 = vmov 0.0   ;;  %v1820_v3 = vld [vmem:[#allocation10 + $0x30] sm:$0xff]   ;;  %vm1967_vm0 = vmmov 0   ;;  %v1821_v4 = vld [vmem:[#allocation10 + $0x28] sm:$0xff]  }
  0x42   : > { %1609 = vmatprep.subr.bf16.mxu0 %v1966_v2  ;;  %1645 = vmatprep.subr.bf16.mxu1 %v1966_v2  ;;  %v1822_v5 = vld [vmem:[#allocation10 + $0x20] sm:$0xff]   ;;  %v1823_v6 = vld [vmem:[#allocation10 + $0x18] sm:$0xff]   ;;  %v1824_v7 = vld [vmem:[#allocation10 + $0x10] sm:$0xff]  }
  0x43   : > { %1610 = vmatpush3.bf16.msra.mxu0 %v1819_v1  ;;  %1646 = vmatpush3.bf16.msra.mxu1 %v1819_v1  ;;  %v1825_v8 = vld [vmem:[#allocation10 + $0x8] sm:$0xff]   ;;  %v1826_v9 = vld [vmem:[#allocation10] sm:$0xff]   ;;  %v1830_v13 = vld [vmem:[#allocation7 + $0x30] sm:$0xff]  }
  0x44   : > { %1611 = vmatprep.subr.bf16.mxu0 %v1966_v2  ;;  %1647 = vmatprep.subr.bf16.mxu1 %v1966_v2  ;;  %v1827_v10 = vld [vmem:[#allocation7] sm:$0xff]   ;;  %v1828_v11 = vld [vmem:[#allocation7 + $0x28] sm:$0xff]   ;;  %v1831_v14 = vld [vmem:[#allocation7 + $0x10] sm:$0xff]  }
  0x45   : > { %1625 = vmatprep.mubr.msk.bf16.mxu0 %vm1967_vm0, %v1966_v2  ;;  %1661 = vmatprep.mubr.msk.bf16.mxu1 %vm1967_vm0, %v1966_v2  ;;  %v1829_v12 = vld [vmem:[#allocation7 + $0x8] sm:$0xff]   ;;  %v1832_v15 = vld [vmem:[#allocation7 + $0x38] sm:$0xff]   ;;  %v1834_v17 = vld [vmem:[#allocation7 + $0x40] sm:$0xff]  }
  0x46   : > { %v1833_v16 = vld [vmem:[#allocation7 + $0x18] sm:$0xff]   ;;  %v1835_v18 = vld [vmem:[#allocation7 + $0x20] sm:$0xff]   ;;  %v1836_v19 = vld [vmem:[#allocation7 + $0x48] sm:$0xff]  }
  0x47   : > { %1612 = vmatpush3.bf16.msra.mxu0 %v1820_v3  ;;  %1648 = vmatpush3.bf16.msra.mxu1 %v1820_v3  ;;  %v1837_v20 = vld [vmem:[#allocation7 + $0x50] sm:$0xff]   ;;  %v1838_v21 = vld [vmem:[#allocation7 + $0x78] sm:$0xff]   ;;  %v1840_v23 = vld [vmem:[#allocation7 + $0x80] sm:$0xff]  }
  0x48   : > { %1613 = vmatprep.subr.bf16.mxu0 %v1966_v2  ;;  %1649 = vmatprep.subr.bf16.mxu1 %v1966_v2  ;;  %v1839_v22 = vld [vmem:[#allocation7 + $0x58] sm:$0xff]   ;;  %v1841_v24 = vld [vmem:[#allocation7 + $0x60] sm:$0xff]   ;;  %v1842_v25 = vld [vmem:[#allocation7 + $0x88] sm:$0xff]  }
  0x49   : > { %v1843_v26 = vld [vmem:[#allocation7 + $0x68] sm:$0xff]   ;;  %v1844_v27 = vld [vmem:[#allocation7 + $0x90] sm:$0xff]   ;;  %v1846_v29 = vld [vmem:[#allocation7 + $0x98] sm:$0xff]  }
  0x4a   : > { %v1845_v28 = vld [vmem:[#allocation7 + $0x70] sm:$0xff]  }
  0x4b   : > { %1614 = vmatpush3.bf16.msra.mxu0 %v1821_v4  ;;  %1650 = vmatpush3.bf16.msra.mxu1 %v1821_v4 }
  0x4c   : > { %1615 = vmatprep.subr.bf16.mxu0 %v1966_v2  ;;  %1651 = vmatprep.subr.bf16.mxu1 %v1966_v2 }
  0x4f   : > { %1616 = vmatpush3.bf16.msra.mxu0 %v1822_v5  ;;  %1652 = vmatpush3.bf16.msra.mxu1 %v1822_v5 }
  0x50   : > { %1617 = vmatprep.subr.bf16.mxu0 %v1966_v2  ;;  %1653 = vmatprep.subr.bf16.mxu1 %v1966_v2 }
  0x53   : > { %1618 = vmatpush3.bf16.msra.mxu0 %v1823_v6  ;;  %1654 = vmatpush3.bf16.msra.mxu1 %v1823_v6 }
  0x54   : > { %1619 = vmatprep.subr.bf16.mxu0 %v1966_v2  ;;  %1655 = vmatprep.subr.bf16.mxu1 %v1966_v2 }
  0x57   : > { %1620 = vmatpush3.bf16.msra.mxu0 %v1824_v7  ;;  %1656 = vmatpush3.bf16.msra.mxu1 %v1824_v7 }
  0x58   : > { %1621 = vmatprep.subr.bf16.mxu0 %v1966_v2  ;;  %1657 = vmatprep.subr.bf16.mxu1 %v1966_v2 }
  0x5b   : > { %1622 = vmatpush3.bf16.msra.mxu0 %v1825_v8  ;;  %1658 = vmatpush3.bf16.msra.mxu1 %v1825_v8 }
  0x5c   : > { %1623 = vmatprep.subr.bf16.mxu0 %v1966_v2  ;;  %1659 = vmatprep.subr.bf16.mxu1 %v1966_v2 }
  0x5f   : > { %1624 = vmatpush3.bf16.msra.mxu0 %v1826_v9  ;;  %1660 = vmatpush3.bf16.msra.mxu1 %v1826_v9 }
  0x60   : > { %1681 = vmatprep.subr.bf16.mxu0 %v1966_v2  ;;  %1717 = vmatprep.subr.bf16.mxu1 %v1966_v2 }
  0x62   : > { %1626 = vmatmul.mubr.bf16.vlgmr.msra.gmra.mxu0 %v1827_v10  ;;  %1662 = vmatmul.mubr.bf16.vlgmr.msra.gmra.mxu1 %v1828_v11 }
  0x63   : > { %1682 = vmatpush3.bf16.msra.mxu0 %v1819_v1  ;;  %1718 = vmatpush3.bf16.msra.mxu1 %v1819_v1 }
  0x64   : > { %1683 = vmatprep.subr.bf16.mxu0 %v1966_v2  ;;  %1629 = vmatprep.mubr.msk.bf16.mxu0 %vm1967_vm0, %v1966_v2 }
  0x65   : > { %1665 = vmatprep.mubr.msk.bf16.mxu1 %vm1967_vm0, %v1966_v2  ;;  %1719 = vmatprep.subr.bf16.mxu1 %v1966_v2 }
  0x67   : > { %1684 = vmatpush3.bf16.msra.mxu0 %v1820_v3  ;;  %1720 = vmatpush3.bf16.msra.mxu1 %v1820_v3 }
  0x68   : > { %1685 = vmatprep.subr.bf16.mxu0 %v1966_v2  ;;  %1721 = vmatprep.subr.bf16.mxu1 %v1966_v2 }
  0x6a   : > { %1630 = vmatmul.mubr.bf16.gmra.mxu0 %v1829_v12  ;;  %1666 = vmatmul.mubr.bf16.gmra.mxu1 %v1830_v13 }
  0x6b   : > { %1686 = vmatpush3.bf16.msra.mxu0 %v1821_v4  ;;  %1722 = vmatpush3.bf16.msra.mxu1 %v1821_v4 }
  0x6c   : > { %1633 = vmatprep.mubr.msk.bf16.mxu0 %vm1967_vm0, %v1966_v2  ;;  %1669 = vmatprep.mubr.msk.bf16.mxu1 %vm1967_vm0, %v1966_v2 }
  0x6d   : > { %1687 = vmatprep.subr.bf16.mxu0 %v1966_v2  ;;  %1723 = vmatprep.subr.bf16.mxu1 %v1966_v2 }
  0x6f   : > { %1688 = vmatpush3.bf16.msra.mxu0 %v1822_v5  ;;  %1724 = vmatpush3.bf16.msra.mxu1 %v1822_v5 }
  0x70   : > { %1689 = vmatprep.subr.bf16.mxu0 %v1966_v2  ;;  %1725 = vmatprep.subr.bf16.mxu1 %v1966_v2 }
  0x72   : > { %1634 = vmatmul.mubr.bf16.gmra.mxu0 %v1831_v14  ;;  %1670 = vmatmul.mubr.bf16.gmra.mxu1 %v1832_v15 }
  0x73   : > { %1690 = vmatpush3.bf16.msra.mxu0 %v1823_v6  ;;  %1637 = vmatprep.mubr.msk.bf16.mxu0 %vm1967_vm0, %v1966_v2 }
  0x74   : > { %1673 = vmatprep.mubr.msk.bf16.mxu1 %vm1967_vm0, %v1966_v2  ;;  %1726 = vmatpush3.bf16.msra.mxu1 %v1823_v6 }
  0x75   : > { %1691 = vmatprep.subr.bf16.mxu0 %v1966_v2  ;;  %1727 = vmatprep.subr.bf16.mxu1 %v1966_v2 }
  0x77   : > { %1692 = vmatpush3.bf16.msra.mxu0 %v1824_v7 }
  0x78   : > { %1728 = vmatpush3.bf16.msra.mxu1 %v1824_v7  ;;  %1693 = vmatprep.subr.bf16.mxu0 %v1966_v2 }
  0x79   : > { %1729 = vmatprep.subr.bf16.mxu1 %v1966_v2 }
  0x7a   : > { %1638 = vmatmul.mubr.bf16.gmra.mxu0 %v1833_v16  ;;  %1674 = vmatmul.mubr.bf16.gmra.mxu1 %v1834_v17 }
  0x7b   : > { %1641 = vmatprep.mubr.msk.bf16.mxu0 %vm1967_vm0, %v1966_v2  ;;  %1677 = vmatprep.mubr.msk.bf16.mxu1 %vm1967_vm0, %v1966_v2 }
  0x7c   : > { %1694 = vmatpush3.bf16.msra.mxu0 %v1825_v8  ;;  %1730 = vmatpush3.bf16.msra.mxu1 %v1825_v8 }
  0x7d   : > { %1695 = vmatprep.subr.bf16.mxu0 %v1966_v2  ;;  %1731 = vmatprep.subr.bf16.mxu1 %v1966_v2 }
  0x80   : > { %1696 = vmatpush3.bf16.msra.mxu0 %v1826_v9  ;;  %1732 = vmatpush3.bf16.msra.mxu1 %v1826_v9 }
  0x82   : > { %1642 = vmatmul.mubr.bf16.gmra.mxu0 %v1835_v18  ;;  %1678 = vmatmul.mubr.bf16.gmra.mxu1 %v1836_v19 }
  0x83   : > { %1697 = vmatprep.mubr.msk.bf16.mxu0 %vm1967_vm0, %v1966_v2  ;;  %1733 = vmatprep.mubr.msk.bf16.mxu1 %vm1967_vm0, %v1966_v2 }
  0x8a   : > { %1698 = vmatmul.mubr.bf16.vlgmr.msra.gmra.mxu0 %v1837_v20  ;;  %1734 = vmatmul.mubr.bf16.vlgmr.msra.gmra.mxu1 %v1838_v21 }
  0x8b   : > { %1701 = vmatprep.mubr.msk.bf16.mxu0 %vm1967_vm0, %v1966_v2  ;;  %1737 = vmatprep.mubr.msk.bf16.mxu1 %vm1967_vm0, %v1966_v2 }
  0x92   : > { %1702 = vmatmul.mubr.bf16.gmra.mxu0 %v1839_v22  ;;  %1738 = vmatmul.mubr.bf16.gmra.mxu1 %v1840_v23 }
  0x93   : > { %1705 = vmatprep.mubr.msk.bf16.mxu0 %vm1967_vm0, %v1966_v2  ;;  %1741 = vmatprep.mubr.msk.bf16.mxu1 %vm1967_vm0, %v1966_v2 }
  0x9a   : > { %1706 = vmatmul.mubr.bf16.gmra.mxu0 %v1841_v24  ;;  %1742 = vmatmul.mubr.bf16.gmra.mxu1 %v1842_v25 }
  0x9b   : > { %1709 = vmatprep.mubr.msk.bf16.mxu0 %vm1967_vm0, %v1966_v2  ;;  %1745 = vmatprep.mubr.msk.bf16.mxu1 %vm1967_vm0, %v1966_v2 }
  0xa2   : > { %1710 = vmatmul.mubr.bf16.gmra.mxu0 %v1843_v26  ;;  %1746 = vmatmul.mubr.bf16.gmra.mxu1 %v1844_v27 }
  0xa3   : > { %1713 = vmatprep.mubr.msk.bf16.mxu0 %vm1967_vm0, %v1966_v2  ;;  %1749 = vmatprep.mubr.msk.bf16.mxu1 %vm1967_vm0, %v1966_v2 }
  0xaa   : > { %1714 = vmatmul.mubr.bf16.gmra.mxu0 %v1845_v28  ;;  %1750 = vmatmul.mubr.bf16.gmra.mxu1 %v1846_v29 }
 0x122   : > { %v2137_v30 = vpop.f32.mrf.mxu0  ;;  %v2139_v31 = vpop.f32.mrf.mxu1 }
 0x123   : > { %914 = vst [vmem:[#allocation6 + $0xb0] sm:$0xff] %v2137_v30  ;;  %1438 = vst [vmem:[#allocation6 + $0x138] sm:$0xff] %v2139_v31  ;;  %v796_v16 = vmul.f32 %v2137_v30, %v2137_v30  ;;  %v825_v18 = vmul.f32 %v2139_v31, %v2139_v31 }
 0x124   : > { %v1627_v32 = vpop.f32.mrf.mxu0  ;;  %v1663_v33 = vpop.f32.mrf.mxu1 }
 0x126   : > { %v2143_v34 = vpop.f32.mrf.mxu0  ;;  %v2145_v35 = vpop.f32.mrf.mxu1 }
 0x127   : > { %915 = vst [vmem:[#allocation6 + $0xd0] sm:$0xff] %v2143_v34  ;;  %1439 = vst [vmem:[#allocation6 + $0xf0] sm:$0xff] %v2145_v35  ;;  %v797_v12 = vmul.f32 %v2143_v34, %v2143_v34  ;;  %v826_v13 = vmul.f32 %v2145_v35, %v2145_v35  ;;  %v787_v19 = vadd.f32 %v2143_v34, %v2137_v30 }
 0x128   : > { %v1628_v36 = vpop.f32.mrf.mxu0  ;;  %v1664_v37 = vpop.f32.mrf.mxu1  ;;  %v815_v20 = vadd.f32 %v2145_v35, %v2139_v31 }
 0x129   : > { %v806_v24 = vadd.f32 %v797_v12, %v796_v16  ;;  %v835_v26 = vadd.f32 %v826_v13, %v825_v18 }
 0x12a   : > { %v2149_v38 = vpop.f32.mrf.mxu0  ;;  %v2151_v39 = vpop.f32.mrf.mxu1 }
 0x12b   : > { %916 = vst [vmem:[#allocation6 + $0x10] sm:$0xff] %v2149_v38  ;;  %1440 = vst [vmem:[#allocation6 + $0x18] sm:$0xff] %v2151_v39  ;;  %v798_v17 = vmul.f32 %v2149_v38, %v2149_v38  ;;  %v827_v21 = vmul.f32 %v2151_v39, %v2151_v39  ;;  %v788_v27 = vadd.f32 %v787_v19, %v2149_v38 }
 0x12c   : > { %v1631_v40 = vpop.f32.mrf.mxu0  ;;  %v1667_v41 = vpop.f32.mrf.mxu1  ;;  %v816_v28 = vadd.f32 %v815_v20, %v2151_v39 }
 0x12d   : > { %v807_v32 = vadd.f32 %v806_v24, %v798_v17  ;;  %v836_v34 = vadd.f32 %v835_v26, %v827_v21 }
 0x12e   : > { %v2155_v42 = vpop.f32.mrf.mxu0  ;;  %v2157_v43 = vpop.f32.mrf.mxu1 }
 0x12f   : > { %917 = vst [vmem:[#allocation6 + $0x48] sm:$0xff] %v2155_v42  ;;  %1441 = vst [vmem:[#allocation6 + $0xc8] sm:$0xff] %v2157_v43  ;;  %v799_v25 = vmul.f32 %v2155_v42, %v2155_v42  ;;  %v828_v29 = vmul.f32 %v2157_v43, %v2157_v43  ;;  %v789_v35 = vadd.f32 %v788_v27, %v2155_v42 }
 0x130   : > { %v1632_v44 = vpop.f32.mrf.mxu0  ;;  %v1668_v45 = vpop.f32.mrf.mxu1  ;;  %v817_v36 = vadd.f32 %v816_v28, %v2157_v43 }
 0x131   : > { %v808_v39 = vadd.f32 %v807_v32, %v799_v25  ;;  %v837_v44 = vadd.f32 %v836_v34, %v828_v29 }
 0x132   : > { %v2161_v46 = vpop.f32.mrf.mxu0  ;;  %v2163_v47 = vpop.f32.mrf.mxu1 }
 0x133   : > { %918 = vst [vmem:[#allocation6 + $0x120] sm:$0xff] %v2161_v46  ;;  %1442 = vst [vmem:[#allocation6 + $0x70] sm:$0xff] %v2163_v47  ;;  %v800_v33 = vmul.f32 %v2161_v46, %v2161_v46  ;;  %v829_v37 = vmul.f32 %v2163_v47, %v2163_v47  ;;  %v790_v45 = vadd.f32 %v789_v35, %v2161_v46 }
 0x134   : > { %v1635_v48 = vpop.f32.mrf.mxu0  ;;  %v1671_v49 = vpop.f32.mrf.mxu1  ;;  %v818_v42 = vadd.f32 %v817_v36, %v2163_v47 }
 0x136   : > { %v2167_v50 = vpop.f32.mrf.mxu0  ;;  %v2169_v51 = vpop.f32.mrf.mxu1 }
 0x137   : > { %919 = vst [vmem:[#allocation6 + $0x38] sm:$0xff] %v2167_v50  ;;  %1443 = vst [vmem:[#allocation6 + $0x20] sm:$0xff] %v2169_v51  ;;  %v801_v41 = vmul.f32 %v2167_v50, %v2167_v50  ;;  %v830_v43 = vmul.f32 %v2169_v51, %v2169_v51 }
 0x138   : > { %v1636_v52 = vpop.f32.mrf.mxu0  ;;  %v1672_v53 = vpop.f32.mrf.mxu1 }
 0x139   : > { %v809_v52 = vadd.f32 %v808_v39, %v800_v33 }
 0x13a   : > { %v2173_v54 = vpop.f32.mrf.mxu0  ;;  %v2175_v55 = vpop.f32.mrf.mxu1 }
 0x13b   : > { %920 = vst [vmem:[#allocation6 + $0xf8] sm:$0xff] %v2173_v54  ;;  %1444 = vst [vmem:[#allocation6 + $0x128] sm:$0xff] %v2175_v55  ;;  %v802_v53 = vmul.f32 %v2173_v54, %v2173_v54  ;;  %v810_v47 = vadd.f32 %v809_v52, %v801_v41 }
 0x13c   : > { %v1639_v56 = vpop.f32.mrf.mxu0  ;;  %v1675_v57 = vpop.f32.mrf.mxu1 }
 0x13d   : > { %v838_v56 = vadd.f32 %v837_v44, %v829_v37  ;;  %v791_v57 = vadd.f32 %v790_v45, %v2167_v50  ;;  %v811_v12 = vadd.f32 %v810_v47, %v802_v53 }
 0x13e   : > { %v2179_v58 = vpop.f32.mrf.mxu0  ;;  %v2181_v59 = vpop.f32.mrf.mxu1 }
 0x13f   : > { %921 = vst [vmem:[#allocation6 + $0x100] sm:$0xff] %v2179_v58  ;;  %1445 = vst [vmem:[#allocation6 + $0x110] sm:$0xff] %v2181_v59  ;;  %v832_v50 = vmul.f32 %v2181_v59, %v2181_v59 }
 0x140   : > { %v1640_v60 = vpop.f32.mrf.mxu0  ;;  %v1676_v61 = vpop.f32.mrf.mxu1 }
 0x141   : > { %v819_v60 = vadd.f32 %v818_v42, %v2169_v51  ;;  %v831_v61 = vmul.f32 %v2175_v55, %v2175_v55 }
 0x142   : > { %v2185_v62 = vpop.f32.mrf.mxu0  ;;  %v2187_v63 = vpop.f32.mrf.mxu1 }
 0x143   : > { %922 = vst [vmem:[#allocation6 + $0x80] sm:$0xff] %v2185_v62  ;;  %1446 = vst [vmem:[#allocation6 + $0x8] sm:$0xff] %v2187_v63 }
 0x144   : > { %v1643_v0 = vpop.f32.mrf.mxu0  ;;  %v1679_v1 = vpop.f32.mrf.mxu1 }
 0x145   : > { %v803_v1 = vmul.f32 %v2179_v58, %v2179_v58 }
 0x146   : > { %v2191_v2 = vpop.f32.mrf.mxu0  ;;  %v2193_v3 = vpop.f32.mrf.mxu1 }
 0x147   : > { %923 = vst [vmem:[#allocation6 + $0x108] sm:$0xff] %v2191_v2  ;;  %1447 = vst [vmem:[#allocation6 + $0x98] sm:$0xff] %v2193_v3 }
 0x148   : > { %v1644_v4 = vpop.f32.mrf.mxu0  ;;  %v1680_v5 = vpop.f32.mrf.mxu1 }
 0x149   : > { %v839_v4 = vadd.f32 %v838_v56, %v830_v43  ;;  %v792_v5 = vadd.f32 %v791_v57, %v2173_v54 }
 0x14a   : > { %v2197_v6 = vpop.f32.mrf.mxu0  ;;  %v2199_v7 = vpop.f32.mrf.mxu1 }
 0x14b   : > { %1448 = vst [vmem:[#allocation6 + $0xa8] sm:$0xff] %v2197_v6  ;;  %1458 = vst [vmem:[#allocation6 + $0x50] sm:$0xff] %v2199_v7  ;;  %v855_v19 = vmul.f32 %v2197_v6, %v2197_v6 }
 0x14c   : > { %v1699_v8 = vpop.f32.mrf.mxu0  ;;  %v1735_v9 = vpop.f32.mrf.mxu1 }
 0x14d   : > { %v820_v8 = vadd.f32 %v819_v60, %v2175_v55  ;;  %v812_v55 = vadd.f32 %v811_v12, %v803_v1  ;;  %v805_v60 = vmul.f32 %v2191_v2, %v2191_v2 }
 0x14e   : > { %v2203_v10 = vpop.f32.mrf.mxu0  ;;  %v2205_v11 = vpop.f32.mrf.mxu1 }
 0x14f   : > { %1449 = vst [vmem:[#allocation6 + $0x90] sm:$0xff] %v2203_v10  ;;  %1459 = vst [vmem:[#allocation6 + $0xe8] sm:$0xff] %v2205_v11  ;;  %v856_v13 = vmul.f32 %v2203_v10, %v2203_v10  ;;  %v821_v16 = vadd.f32 %v820_v8, %v2181_v59  ;;  %v886_v17 = vmul.f32 %v2205_v11, %v2205_v11 }
 0x150   : > { %v1700_v14 = vpop.f32.mrf.mxu0  ;;  %v1736_v15 = vpop.f32.mrf.mxu1  ;;  %v845_v20 = vadd.f32 %v2203_v10, %v2197_v6  ;;  %v885_v59 = vmul.f32 %v2199_v7, %v2199_v7  ;;  %v875_v24 = vadd.f32 %v2205_v11, %v2199_v7  ;;  %v804_v6 = vmul.f32 %v2185_v62, %v2185_v62 }
 0x151   : > { %v840_v14 = vadd.f32 %v839_v4, %v831_v61  ;;  %v793_v15 = vadd.f32 %v792_v5, %v2179_v58  ;;  %v865_v10 = vadd.f32 %v856_v13, %v855_v19 }
 0x152   : > { %v2225_v22 = vpop.f32.mrf.mxu0  ;;  %v2227_v23 = vpop.f32.mrf.mxu1  ;;  %v813_v42 = vadd.f32 %v812_v55, %v804_v6 }
 0x153   : > { %1450 = vst [vmem:[#allocation6 + $0xe0] sm:$0xff] %v2225_v22  ;;  %1460 = vst [vmem:[#allocation6 + $0x58] sm:$0xff] %v2227_v23  ;;  %v857_v21 = vmul.f32 %v2225_v22, %v2225_v22  ;;  %v841_v58 = vadd.f32 %v840_v14, %v832_v50  ;;  %v887_v25 = vmul.f32 %v2227_v23, %v2227_v23 }
 0x154   : > { %v1703_v30 = vpop.f32.mrf.mxu0  ;;  %v1739_v31 = vpop.f32.mrf.mxu1  ;;  %v846_v28 = vadd.f32 %v845_v20, %v2225_v22  ;;  %v876_v32 = vadd.f32 %v875_v24, %v2227_v23  ;;  %v794_v34 = vadd.f32 %v793_v15, %v2185_v62  ;;  %v822_v22 = vadd.f32 %v821_v16, %v2187_v63 }
 0x155   : > { %v833_v30 = vmul.f32 %v2187_v63, %v2187_v63  ;;  %v895_v31 = vadd.f32 %v886_v17, %v885_v59  ;;  %v866_v35 = vadd.f32 %v865_v10, %v857_v21 }
 0x156   : > { %v645_v38 = vpop.f32.mrf.mxu0  ;;  %v2243_v40 = vpop.f32.mrf.mxu1  ;;  %v823_v12 = vadd.f32 %v822_v22, %v2193_v3  ;;  %v905_v22 = vld [vmem:[#allocation2] sm:$0xff] }
 0x157   : > { %1451 = vst [vmem:[#allocation6 + $0x88] sm:$0xff] %v645_v38  ;;  %1461 = vst [vmem:[#allocation6 + $0x78] sm:$0xff] %v2243_v40  ;;  %v858_v29 = vmul.f32 %v645_v38, %v645_v38  ;;  %v888_v7 = vmul.f32 %v2243_v40, %v2243_v40  ;;  %v847_v36 = vadd.f32 %v846_v28, %v645_v38 }
 0x158   : > { %v1704_v48 = vpop.f32.mrf.mxu0  ;;  %v1740_v49 = vpop.f32.mrf.mxu1  ;;  %v896_v39 = vadd.f32 %v895_v31, %v887_v25  ;;  %v877_v41 = vadd.f32 %v876_v32, %v2243_v40  ;;  %v842_v52 = vadd.f32 %v841_v58, %v833_v30  ;;  %v834_v40 = vmul.f32 %v2193_v3, %v2193_v3 }
 0x159   : > { %v867_v43 = vadd.f32 %v866_v35, %v858_v29 }
 0x15a   : > { %v650_v46 = vpop.f32.mrf.mxu0  ;;  %v764_v0 = vpop.f32.mrf.mxu1  ;;  %v897_v53 = vadd.f32 %v896_v39, %v888_v7  ;;  %v843_v20 = vadd.f32 %v842_v52, %v834_v40 }
 0x15b   : > { %1452 = vst [vmem:[#allocation6 + $0xc0] sm:$0xff] %v650_v46  ;;  %1462 = vst [vmem:[#allocation6 + $0x30] sm:$0xff] %v764_v0  ;;  %v859_v37 = vmul.f32 %v650_v46, %v650_v46  ;;  %v889_v44 = vmul.f32 %v764_v0, %v764_v0  ;;  %v848_v48 = vadd.f32 %v847_v36, %v650_v46 }
 0x15c   : > { %v1707_v51 = vpop.f32.mrf.mxu0  ;;  %v1743_v9 = vpop.f32.mrf.mxu1  ;;  %v878_v62 = vadd.f32 %v877_v41, %v764_v0  ;;  %v795_v0 = vadd.f32 %v794_v34, %v2191_v2 }
 0x15d   : > { %v868_v63 = vadd.f32 %v867_v43, %v859_v37  ;;  %v898_v1 = vadd.f32 %v897_v53, %v889_v44 }
 0x15e   : > { %v653_v54 = vpop.f32.mrf.mxu0  ;;  %v767_v18 = vpop.f32.mrf.mxu1  ;;  %v824_v3 = vadd.f32 %v823_v12, %v795_v0 }
 0x15f   : > { %1453 = vst [vmem:[#allocation6 + $0x118] sm:$0xff] %v653_v54  ;;  %1463 = vst [vmem:[#allocation6 + $0x40] sm:$0xff] %v767_v18  ;;  %v860_v49 = vmul.f32 %v653_v54, %v653_v54  ;;  %v890_v56 = vmul.f32 %v767_v18, %v767_v18  ;;  %v849_v61 = vadd.f32 %v848_v48, %v653_v54 }
 0x160   : > { %v1708_v26 = vpop.f32.mrf.mxu0  ;;  %v1744_v27 = vpop.f32.mrf.mxu1  ;;  %v879_v46 = vadd.f32 %v878_v62, %v767_v18  ;;  %v814_v18 = vadd.f32 %v813_v42, %v805_v60 }
 0x161   : > { %v869_v50 = vadd.f32 %v868_v63, %v860_v49  ;;  %v899_v13 = vadd.f32 %v898_v1, %v890_v56 }
 0x162   : > { %v658_v11 = vpop.f32.mrf.mxu0  ;;  %v772_v33 = vpop.f32.mrf.mxu1  ;;  %v844_v7 = vadd.f32 %v843_v20, %v814_v18 }
 0x163   : > { %1454 = vst [vmem:[#allocation6 + $0xd8] sm:$0xff] %v658_v11  ;;  %1464 = vst [vmem:[#allocation6 + $0x28] sm:$0xff] %v772_v33  ;;  %v861_v47 = vmul.f32 %v658_v11, %v658_v11  ;;  %v891_v4 = vmul.f32 %v772_v33, %v772_v33  ;;  %v850_v51 = vadd.f32 %v849_v61, %v658_v11 }
 0x164   : > { %v1711_v45 = vpop.f32.mrf.mxu0  ;;  %v1747_v23 = vpop.f32.mrf.mxu1  ;;  %v880_v14 = vadd.f32 %v879_v46, %v772_v33 }
 0x165   : > { %v870_v54 = vadd.f32 %v869_v50, %v861_v47  ;;  %v900_v21 = vadd.f32 %v899_v13, %v891_v4  ;;  %v908_v45 = vld [vmem:[#allocation3] sm:$0xff] }
 0x166   : > { %v661_v38 = vpop.f32.mrf.mxu0  ;;  %v775_v57 = vpop.f32.mrf.mxu1 }
 0x167   : > { %1455 = vst [vmem:[#allocation6 + $0xa0] sm:$0xff] %v661_v38  ;;  %1465 = vst [vmem:[#allocation6] sm:$0xff] %v775_v57  ;;  %v862_v9 = vmul.f32 %v661_v38, %v661_v38  ;;  %v892_v15 = vmul.f32 %v775_v57, %v775_v57  ;;  %v851_v55 = vadd.f32 %v850_v51, %v661_v38 }
 0x168   : > { %v1712_v5 = vpop.f32.mrf.mxu0  ;;  %v1748_v8 = vpop.f32.mrf.mxu1  ;;  %v881_v58 = vadd.f32 %v880_v14, %v775_v57 }
 0x169   : > { %v871_v24 = vadd.f32 %v870_v54, %v862_v9  ;;  %v901_v27 = vadd.f32 %v900_v21, %v892_v15 }
 0x16a   : > { %v666_v16 = vpop.f32.mrf.mxu0  ;;  %v780_v17 = vpop.f32.mrf.mxu1 }
 0x16b   : > { %v863_v19 = vmul.f32 %v666_v16, %v666_v16  ;;  %1456 = vst [vmem:[#allocation6 + $0x68] sm:$0xff] %v666_v16  ;;  %1466 = vst [vmem:[#allocation6 + $0xb8] sm:$0xff] %v780_v17  ;;  %v852_v25 = vadd.f32 %v851_v55, %v666_v16  ;;  %v893_v26 = vmul.f32 %v780_v17, %v780_v17 }
 0x16c   : > { %v1715_v2 = vpop.f32.mrf.mxu0  ;;  %v1751_v59 = vpop.f32.mrf.mxu1  ;;  %v882_v6 = vadd.f32 %v881_v58, %v780_v17 }
 0x16d   : > { %v872_v29 = vadd.f32 %v871_v24, %v863_v19  ;;  %v902_v34 = vadd.f32 %v901_v27, %v893_v26 }
 0x16e   : > { %v669_v10 = vpop.f32.mrf.mxu0  ;;  %v783_v28 = vpop.f32.mrf.mxu1 }
 0x16f   : > { %v853_v30 = vadd.f32 %v852_v25, %v669_v10  ;;  %v864_v31 = vmul.f32 %v669_v10, %v669_v10  ;;  %1457 = vst [vmem:[#allocation6 + $0x130] sm:$0xff] %v669_v10  ;;  %v894_v32 = vmul.f32 %v783_v28, %v783_v28  ;;  %1467 = vst [vmem:[#allocation6 + $0x60] sm:$0xff] %v783_v28 }
 0x170   : > { %v1716_v11 = vpop.f32.mrf.mxu0  ;;  %v1752_v33 = vpop.f32.mrf.mxu1  ;;  %v883_v37 = vadd.f32 %v882_v6, %v783_v28 }
 0x171   : > { %v854_v35 = vadd.f32 %v853_v30, %v824_v3  ;;  %v873_v36 = vadd.f32 %v872_v29, %v864_v31  ;;  %v903_v44 = vadd.f32 %v902_v34, %v894_v32 }
 0x173   : > { %v874_v39 = vadd.f32 %v873_v36, %v844_v7  ;;  %v884_v41 = vadd.f32 %v883_v37, %v854_v35 }
 0x175   : > { %v904_v23 = vadd.f32 %v903_v44, %v874_v39  ;;  %v906_v42 = vadd.f32 %v905_v22, %v884_v41 }
 0x177   : > { %907 = vst [vmem:[#allocation2] sm:$0xff] %v906_v42  ;;  %v909_v43 = vadd.f32 %v908_v45, %v904_v23 }
 0x179   : > { %910 = vst [vmem:[#allocation3] sm:$0xff] %v909_v43 }
 0x17a PF: > { %p963_p3 = scmp.eq.s32.totalorder %s1951_s15, 1 }
 0x17b   : > { %v987_v51 = vld [vmem:[%s2419_s2] sm:$0x1] (%p963_p3) }
 0x17c   : > { %967 = sbr.rel (!%p963_p3) target bundleno = 426 (0x1aa), region = 56  ;;  %v992_v13 = vld [vmem:[%s2420_s3] sm:$0x1] (%p963_p3) }
 0x17e   : > { %v968_v48 = vld [vmem:[#allocation2] sm:$0xff] (%p963_p3) }
 0x17f   : > { %v969_v52 = vrot.slane (%p963_p3), %v968_v48, 4 }
 0x180   : > { %v975_v49 = vld [vmem:[#allocation3] sm:$0xff] (%p963_p3) }
 0x181   : > { %v976_v53 = vrot.slane %v975_v49, 4  ;;  %v970_v62 = vadd.f32 %v969_v52, %v968_v48 }
 0x183   : > { %v977_v56 = vadd.f32 %v976_v53, %v975_v49  ;;  %v971_v38 = vrot.slane %v970_v62, 2 }
 0x185   : > { %v978_v57 = vrot.slane %v977_v56, 2  ;;  %v972_v60 = vadd.f32 %v971_v38, %v970_v62 }
 0x187   : > { %v979_v63 = vadd.f32 %v978_v57, %v977_v56  ;;  %v973_v61 = vrot.slane %v972_v60, 1 }
 0x189   : > { %v980_v47 = vrot.slane %v979_v63, 1  ;;  %v974_v40 = vadd.f32 %v973_v61, %v972_v60 }
 0x18b   : > { %v981_v1 = vadd.f32 %v980_v47, %v979_v63  ;;  %v982_v46 = vmul.f32 0.0034722222, %v974_v40 }
 0x18d   : > { %v983_v4 = vmul.f32 0.0034722222, %v981_v1  ;;  %v984_v5 = vmul.f32 %v982_v46, %v982_v46 }
 0x18f   : > { %v985_v8 = vsub.f32 %v983_v4, %v984_v5 }
 0x191   : > { %v986_v0 = vmax.f32 %v985_v8, 0.0 }
 0x193   : > { %v988_v50 = vadd.f32 1e-05, %v986_v0 }
 0x195   : > { %1847 = vrsqrt.f32 %v988_v50 }
 0x1a2   : > { %v1848_v9 = vpop.eup %1847 }
 0x1a3   : > { %v990_v12 = vmul.f32 %v1848_v9, %v987_v51 }
 0x1a5   : > { %991 = vst [vmem:[#allocation4] sm:$0x1] %v990_v12  ;;  %v993_v14 = vmul.f32 %v990_v12, %v982_v46 }
 0x1a7   : > { %v994_v15 = vsub.f32 %v992_v13, %v993_v14 }
 0x1a9   : > { %995 = vst [vmem:[#allocation5] sm:$0x1] %v994_v15 }
 0x1aa PF: > { %p1469_p5 = scmp.ne.s32.totalorder %s1951_s15, 1 }
 0x1ac   : > { %998 = sbr.rel (%p1469_p5) target bundleno = 474 (0x1da), region = 60 }
 0x1b1   : > { %v1002_v16 = vld [vmem:[#allocation6 + $0xb0] sm:$0xff]  ;;  %v1470_v54 = vld [vmem:[#allocation6 + $0x138] sm:$0xff]  ;;  %v1480_v19 = vld [vmem:[#allocation6 + $0xa8] sm:$0xff] }
 0x1b2   : > { %v1003_v17 = vld [vmem:[#allocation6 + $0xd0] sm:$0xff]  ;;  %v1491_v21 = vld [vmem:[#allocation6 + $0xe8] sm:$0xff]  ;;  %v2307_v58 = vld [vmem:[#allocation4] ss:$0 sm:$0xff] }
 0x1b3   : > { %v1471_v55 = vld [vmem:[#allocation6 + $0xf0] sm:$0xff]  ;;  %v2309_v2 = vld [vmem:[#allocation5] ss:$0 sm:$0xff]  ;;  %v1059_v59 = vmul.f32 %v2307_v58, %v1002_v16  ;;  %v1060_v24 = vmul.f32 %v2307_v58, %v1003_v17  ;;  %v1085_v25 = vmul.f32 %v2307_v58, %v1470_v54  ;;  %v1115_v3 = vmul.f32 %v2307_v58, %v1480_v19  ;;  %v1005_v29 = vld [vmem:[#allocation6 + $0x48] sm:$0xff] }
 0x1b4   : > { %v1481_v18 = vld [vmem:[#allocation6 + $0x90] sm:$0xff]  ;;  %v1086_v26 = vmul.f32 %v2307_v58, %v1471_v55  ;;  %v1146_v10 = vmul.f32 %v2307_v58, %v1491_v21  ;;  %v1472_v30 = vld [vmem:[#allocation6 + $0x18] sm:$0xff]  ;;  %v1473_v33 = vld [vmem:[#allocation6 + $0xc8] sm:$0xff]  ;;  %v1062_v23 = vmul.f32 %v2307_v58, %v1005_v29 }
 0x1b5   : > { %v1490_v20 = vld [vmem:[#allocation6 + $0x50] sm:$0xff]  ;;  %v1116_v27 = vmul.f32 %v2307_v58, %v1481_v18  ;;  %v1075_v31 = vadd.f32 %v2309_v2, %v1059_v59  ;;  %v1076_v32 = vadd.f32 %v2309_v2, %v1060_v24  ;;  %v1095_v7 = vadd.f32 %v2309_v2, %v1085_v25  ;;  %v1482_v34 = vld [vmem:[#allocation6 + $0xe0] sm:$0xff]  ;;  %v1483_v35 = vld [vmem:[#allocation6 + $0x88] sm:$0xff] }
 0x1b6   : > { %v1145_v6 = vmul.f32 %v2307_v58, %v1490_v20  ;;  %v1004_v28 = vld [vmem:[#allocation6 + $0x10] sm:$0xff]  ;;  %v1096_v11 = vadd.f32 %v2309_v2, %v1086_v26  ;;  %v1125_v36 = vadd.f32 %v2309_v2, %v1115_v3  ;;  %v1156_v39 = vadd.f32 %v2309_v2, %v1146_v10  ;;  %v1492_v42 = vld [vmem:[#allocation6 + $0x58] sm:$0xff]  ;;  %v1006_v60 = vld [vmem:[#allocation6 + $0x120] sm:$0xff] }
 0x1b7   : > { %v1126_v37 = vadd.f32 %v2309_v2, %v1116_v27  ;;  %v1105_v41 = vmax.f32 %v1075_v31, %v1095_v7  ;;  %v1061_v45 = vmul.f32 %v2307_v58, %v1004_v28  ;;  %v1493_v43 = vld [vmem:[#allocation6 + $0x78] sm:$0xff]  ;;  %v1087_v48 = vmul.f32 %v2307_v58, %v1472_v30  ;;  %v1474_v51 = vld [vmem:[#allocation6 + $0x70] sm:$0xff]  ;;  %v1475_v9 = vld [vmem:[#allocation6 + $0x20] sm:$0xff] }
 0x1b8   : > { %v1155_v22 = vadd.f32 %v2309_v2, %v1145_v6  ;;  %v1106_v44 = vmax.f32 %v1076_v32, %v1096_v11  ;;  %v1088_v49 = vmul.f32 %v2307_v58, %v1473_v33  ;;  %v1117_v52 = vmul.f32 %v2307_v58, %v1482_v34  ;;  %v1007_v63 = vld [vmem:[#allocation6 + $0x38] sm:$0xff]  ;;  %v1484_v12 = vld [vmem:[#allocation6 + $0xc0] sm:$0xff]  ;;  %v1494_v19 = vld [vmem:[#allocation6 + $0x30] sm:$0xff] }
 0x1b9   : > { %v1118_v53 = vmul.f32 %v2307_v58, %v1483_v35  ;;  %v1135_v62 = vmax.f32 %v1105_v41, %v1125_v36  ;;  %v1077_v38 = vadd.f32 %v2309_v2, %v1061_v45  ;;  %v1078_v57 = vadd.f32 %v2309_v2, %v1062_v23  ;;  %v1485_v55 = vld [vmem:[#allocation6 + $0x118] sm:$0xff]  ;;  %v1495_v21 = vld [vmem:[#allocation6 + $0x40] sm:$0xff]  ;;  %v1476_v34 = vld [vmem:[#allocation6 + $0x128] sm:$0xff] }
 0x1ba   : > { %v1136_v56 = vmax.f32 %v1106_v44, %v1126_v37  ;;  %v1097_v61 = vadd.f32 %v2309_v2, %v1087_v48  ;;  %v1098_v47 = vadd.f32 %v2309_v2, %v1088_v49  ;;  %v1127_v40 = vadd.f32 %v2309_v2, %v1117_v52  ;;  %v1008_v30 = vld [vmem:[#allocation6 + $0xf8] sm:$0xff]  ;;  %v1009_v33 = vld [vmem:[#allocation6 + $0x100] sm:$0xff]  ;;  %v1477_v35 = vld [vmem:[#allocation6 + $0x110] sm:$0xff] }
 0x1bb   : > { %v1128_v1 = vadd.f32 %v2309_v2, %v1118_v53  ;;  %v1165_v46 = vmax.f32 %v1135_v62, %v1155_v22  ;;  %v1147_v5 = vmul.f32 %v2307_v58, %v1492_v42  ;;  %v1148_v8 = vmul.f32 %v2307_v58, %v1493_v43  ;;  %v1486_v41 = vld [vmem:[#allocation6 + $0xd8] sm:$0xff]  ;;  %v1487_v42 = vld [vmem:[#allocation6 + $0xa0] sm:$0xff]  ;;  %v1496_v49 = vld [vmem:[#allocation6 + $0x28] sm:$0xff] }
 0x1bc   : > { %v1166_v4 = vmax.f32 %v1136_v56, %v1156_v39  ;;  %v1107_v0 = vmax.f32 %v1077_v38, %v1097_v61  ;;  %v1108_v50 = vmax.f32 %v1078_v57, %v1098_v47  ;;  %v1063_v13 = vmul.f32 %v2307_v58, %v1006_v60  ;;  %v1497_v57 = vld [vmem:[#allocation6] sm:$0xff] }
 0x1bd   : > { %v1064_v14 = vmul.f32 %v2307_v58, %v1007_v63  ;;  %v1175_v15 = vmax.f32 %v1165_v46, 0.0  ;;  %v1157_v17 = vadd.f32 %v2309_v2, %v1147_v5  ;;  %v1158_v54 = vadd.f32 %v2309_v2, %v1148_v8  ;;  %v1010_v46 = vld [vmem:[#allocation6 + $0x80] sm:$0xff] }
 0x1be   : > { %v1176_v16 = vmax.f32 %v1166_v4, 0.0  ;;  %v1137_v18 = vmax.f32 %v1107_v0, %v1127_v40  ;;  %v1138_v20 = vmax.f32 %v1108_v50, %v1128_v1  ;;  %v1079_v59 = vadd.f32 %v2309_v2, %v1063_v13  ;;  %v1011_v50 = vld [vmem:[#allocation6 + $0x108] sm:$0xff] }
 0x1bf   : > { %v1080_v24 = vadd.f32 %v2309_v2, %v1064_v14  ;;  %v1089_v26 = vmul.f32 %v2307_v58, %v1474_v51  ;;  %v1090_v3 = vmul.f32 %v2307_v58, %v1475_v9  ;;  %v1119_v27 = vmul.f32 %v2307_v58, %v1484_v12  ;;  %v1478_v14 = vld [vmem:[#allocation6 + $0x8] sm:$0xff] }
 0x1c0   : > { %v1531_v25 = vpack.c.bf16 %v1176_v16, %v1175_v15  ;;  %v1167_v6 = vmax.f32 %v1137_v18, %v1157_v17  ;;  %v1168_v10 = vmax.f32 %v1138_v20, %v1158_v54  ;;  %v1120_v28 = vmul.f32 %v2307_v58, %v1485_v55  ;;  %v1479_v15 = vld [vmem:[#allocation6 + $0x98] sm:$0xff]  ;;  %v1488_v55 = vld [vmem:[#allocation6 + $0x68] sm:$0xff] }
 0x1c1   : > { %v1149_v29 = vmul.f32 %v2307_v58, %v1494_v19  ;;  %v1099_v31 = vadd.f32 %v2309_v2, %v1089_v26  ;;  %v1100_v32 = vadd.f32 %v2309_v2, %v1090_v3  ;;  %v1129_v7 = vadd.f32 %v2309_v2, %v1119_v27  ;;  %v1499_v3 = vld [vmem:[#allocation6 + $0x60] sm:$0xff] }
 0x1c2   : > { %1532 = vst [vmem:[#allocation12] sm:$0xff] %v1531_v25   ;;  %v1150_v11 = vmul.f32 %v2307_v58, %v1495_v21  ;;  %v1177_v36 = vmax.f32 %v1167_v6, 0.0  ;;  %v1178_v37 = vmax.f32 %v1168_v10, 0.0  ;;  %v1130_v22 = vadd.f32 %v2309_v2, %v1120_v28 }
 0x1c3   : > { %v1159_v39 = vadd.f32 %v2309_v2, %v1149_v29  ;;  %v1109_v44 = vmax.f32 %v1079_v59, %v1099_v31  ;;  %v1110_v45 = vmax.f32 %v1080_v24, %v1100_v32  ;;  %v1065_v43 = vmul.f32 %v2307_v58, %v1008_v30  ;;  %v1489_v59 = vld [vmem:[#allocation6 + $0x130] sm:$0xff]  ;;  %v1498_v24 = vld [vmem:[#allocation6 + $0xb8] sm:$0xff] }
 0x1c4   : > { %v1160_v23 = vadd.f32 %v2309_v2, %v1150_v11  ;;  %v1536_v48 = vpack.c.bf16 %v1178_v37, %v1177_v36  ;;  %v1066_v52 = vmul.f32 %v2307_v58, %v1009_v33  ;;  %v1091_v53 = vmul.f32 %v2307_v58, %v1476_v34 }
 0x1c5   : > { %v1092_v62 = vmul.f32 %v2307_v58, %v1477_v35  ;;  %v1139_v56 = vmax.f32 %v1109_v44, %v1129_v7  ;;  %v1140_v38 = vmax.f32 %v1110_v45, %v1130_v22  ;;  %v1081_v60 = vadd.f32 %v2309_v2, %v1065_v43 }
 0x1c6   : > { %v1121_v63 = vmul.f32 %v2307_v58, %v1486_v41  ;;  %1553 = vst [vmem:[#allocation12 + $0x8] sm:$0xff] %v1536_v48   ;;  %v1082_v61 = vadd.f32 %v2309_v2, %v1066_v52  ;;  %v1101_v47 = vadd.f32 %v2309_v2, %v1091_v53  ;;  %v1122_v1 = vmul.f32 %v2307_v58, %v1487_v42 }
 0x1c7   : > { %v1102_v40 = vadd.f32 %v2309_v2, %v1092_v62  ;;  %v1169_v4 = vmax.f32 %v1139_v56, %v1159_v39  ;;  %v1170_v5 = vmax.f32 %v1140_v38, %v1160_v23  ;;  %v1151_v0 = vmul.f32 %v2307_v58, %v1496_v49 }
 0x1c8   : > { %v1131_v8 = vadd.f32 %v2309_v2, %v1121_v63  ;;  %v1111_v51 = vmax.f32 %v1081_v60, %v1101_v47  ;;  %v1132_v12 = vadd.f32 %v2309_v2, %v1122_v1  ;;  %v1152_v13 = vmul.f32 %v2307_v58, %v1497_v57 }
 0x1c9   : > { %v1112_v9 = vmax.f32 %v1082_v61, %v1102_v40  ;;  %v1179_v16 = vmax.f32 %v1169_v4, 0.0  ;;  %v1180_v17 = vmax.f32 %v1170_v5, 0.0  ;;  %v1161_v54 = vadd.f32 %v2309_v2, %v1151_v0 }
 0x1ca   : > { %v1067_v19 = vmul.f32 %v2307_v58, %v1010_v46  ;;  %v1141_v18 = vmax.f32 %v1111_v51, %v1131_v8  ;;  %v1162_v21 = vadd.f32 %v2309_v2, %v1152_v13  ;;  %v1068_v25 = vmul.f32 %v2307_v58, %v1011_v50 }
 0x1cb   : > { %v1142_v20 = vmax.f32 %v1112_v9, %v1132_v12  ;;  %v1541_v26 = vpack.c.bf16 %v1180_v17, %v1179_v16  ;;  %v1093_v6 = vmul.f32 %v2307_v58, %v1478_v14  ;;  %v1094_v10 = vmul.f32 %v2307_v58, %v1479_v15 }
 0x1cc   : > { %v1083_v27 = vadd.f32 %v2309_v2, %v1067_v19  ;;  %v1171_v28 = vmax.f32 %v1141_v18, %v1161_v54  ;;  %v1084_v30 = vadd.f32 %v2309_v2, %v1068_v25  ;;  %v1123_v31 = vmul.f32 %v2307_v58, %v1488_v55 }
 0x1cd   : > { %v1172_v29 = vmax.f32 %v1142_v20, %v1162_v21  ;;  %1554 = vst [vmem:[#allocation12 + $0x10] sm:$0xff] %v1541_v26   ;;  %v1103_v32 = vadd.f32 %v2309_v2, %v1093_v6  ;;  %v1104_v7 = vadd.f32 %v2309_v2, %v1094_v10  ;;  %v1124_v11 = vmul.f32 %v2307_v58, %v1489_v59 }
 0x1ce   : > { %v1153_v33 = vmul.f32 %v2307_v58, %v1498_v24  ;;  %v1181_v34 = vmax.f32 %v1171_v28, 0.0  ;;  %v1133_v36 = vadd.f32 %v2309_v2, %v1123_v31  ;;  %v1154_v37 = vmul.f32 %v2307_v58, %v1499_v3 }
 0x1cf   : > { %v1182_v35 = vmax.f32 %v1172_v29, 0.0  ;;  %v1113_v22 = vmax.f32 %v1083_v27, %v1103_v32  ;;  %v1114_v39 = vmax.f32 %v1084_v30, %v1104_v7  ;;  %v1134_v41 = vadd.f32 %v2309_v2, %v1124_v11 }
 0x1d0   : > { %v1163_v44 = vadd.f32 %v2309_v2, %v1153_v33  ;;  %v1164_v23 = vadd.f32 %v2309_v2, %v1154_v37 }
 0x1d1   : > { %v1546_v45 = vpack.c.bf16 %v1182_v35, %v1181_v34  ;;  %v1143_v42 = vmax.f32 %v1113_v22, %v1133_v36  ;;  %v1144_v43 = vmax.f32 %v1114_v39, %v1134_v41 }
 0x1d3   : > { %1555 = vst [vmem:[#allocation12 + $0x18] sm:$0xff] %v1546_v45   ;;  %v1173_v48 = vmax.f32 %v1143_v42, %v1163_v44  ;;  %v1174_v49 = vmax.f32 %v1144_v43, %v1164_v23 }
 0x1d5   : > { %v1183_v52 = vmax.f32 %v1173_v48, 0.0  ;;  %v1184_v53 = vmax.f32 %v1174_v49, 0.0 }
 0x1d7   : > { %v1551_v62 = vpack.c.bf16 %v1184_v53, %v1183_v52 }
 0x1d9   : > { %1556 = vst [vmem:[#allocation12 + $0x20] sm:$0xff] %v1551_v62  }
 0x1da PF: > { %p2393_p10 = scmp.eq.s32.totalorder %s1369_s18, 1  ;;  %s1968_s21 = smov [#allocation12]  }
 0x1db   : > { %s1250_s22 = sshll.u32 %s1968_s21, 4  ;;  %s1251_s22 = int_to_ptr.vmem [resolvable:$true] %s1250_s22 }
 0x1dc   : > { %s1901_s23 = scalar_lea.vmem %s1251_s22, 640  ;;  %s1907_s24 = scalar_lea.vmem %s1251_s22, 1280 }
 0x1dd   : > { %p1902_p11 = scmp.ne.s32.totalorder %s1251_s22, %s1901_s23  ;;  %p1908_p13 = scmp.lt.s32.totalorder %s1251_s22, %s1251_s22 }
 0x1de   : > { %p1909_p0 = scmp.lt.s32.totalorder %s1907_s24, %s1901_s23 }
 0x1df   : > { %p1903_p4 = pnand %p1902_p11, %p2393_p10 }
 0x1e0   : > { %p1910_p1 = por %p1909_p0, %p1908_p13 }
 0x1e1   : > { %p1904_p12 = pneg %p1903_p4 }
 0x1e3   : > { %p1911_p2 = pnand %p1910_p1, %p1904_p12 }
 0x1e5   : > { %1914 = shalt.err (!%p1911_p2)
}
 0x1e6   : > { %s1969_s25 = smov 64   ;;  %s1970_s18 = smov 4  }
 0x1e7   : > { %1762 = dma.vmem_to_hbm [thread:$0]  (%p2393_p10), %s1251_s22, 640, %s2421_s4, [#allocation9], %s1969_s25, %s1969_s25, %s1970_s18  }
 0x1e8 PF: > { %p1784_p7 = scmp.eq.s32.totalorder %s1370_s19, 1 }
 0x1ea   : > { %p1774_p8 = pnand %p1784_p7, %p1373_p6 }
 0x1ec   : > { %p1775_p9 = pneg %p1774_p8 }
 0x1ee   : > { %1946 = dma.done.wait (%p1775_p9), [#allocation9], 640  }
 0x1ef   : > { %1948 = vsyncadd (%p1775_p9), [#allocation9], 4294966656  ;;  %s21_s17 = sadd.s32 1, %s1959_s17   ;;  %s2428_s15 = smov %s1955_s16 }
 0x1f0   : > { %p18_p3 = scmp.ge.s32.totalorder %s21_s17, 4   ;;  %s2429_s16 = smov %s2431_s20 }
 0x1f2   :  { %20 = sbr.rel (!%p18_p3) target bundleno = 6 (0x6), region = 112 }
 0x1f7   :  { %1271 = vsyncpa [#allocation8], 1 }
 0x1f8   :  { %1273 = vsyncpa [#allocation8 + $0x1], 1 }
 0x1f9   :  { %1274 = vsyncpa [#allocation11], 1 }
 0x1fa   :  { %1275 = vsyncpa [#allocation9], 1 }
 0x1fb   :  { %1277 = vsyncpa [#allocation9 + $0x1], 1 }

</bundles_post_ra>
